<compile_context>
chip_gen: v7x
topology: tpu7x:2x2x1
jax: 0.10.0
libtpu: 0.0.40
codegen_flags: <defaults>
</compile_context>

<pallas_src>
import jax
import jax.numpy as jnp
from jax.experimental import pallas as pl
from jax.experimental.pallas import tpu as pltpu

N = 100            # hidden width of the PyTorch module
LANE = 128
DEFAULT_TB = 2048  # batch tile (lanes per grid step)


def _round_up(x, m):
    return ((x + m - 1) // m) * m


def _mlp_kernel(x_ref, a_ref, c_ref, w3_ref, b3_ref, o_ref):
    # Batch is on the lane axis; the (zero-padded) hidden dim is on the sublane axis.
    x_row = x_ref[...]                       # (1, TB)   f32, lane-dense
    a = a_ref[...]                           # (Np, 1)   f32   (= W2 @ w1, padded)
    c = c_ref[...]                           # (Np, 1)   f32   (= W2 @ b1 + b2, padded)

    # Folded layers 1+2: VPU broadcast outer product + EUP tanh (f32, v5e-safe).
    z2 = a * x_row + c                       # (Np, TB)  f32
    h2 = jnp.tanh(z2)                        # (Np, TB)  f32  (padded rows stay 0)

    # Layer 3: w3 is pre-cast to the compute dtype and padded to an aligned (8, Np)
    # tile (row 0 real, rows 1..7 zero).  Single MXU matmul, f32 accumulation.
    z3 = jnp.dot(w3_ref[...], h2.astype(w3_ref.dtype),
                 preferred_element_type=jnp.float32)            # (8, TB) f32

    # Result row 0 is the real output; bias-add + tanh in f32, lane-dense store.
    o_ref[...] = jnp.tanh(z3[0:1, :] + b3_ref[0]).astype(o_ref.dtype)   # (1, TB)


def _prep_params(w1, b1, w2, b2, w3, b3, compute_dtype):
    """Fold lin1 into lin2 (f32) and zero-pad / pre-cast params for the kernel."""
    f32 = jnp.float32
    n = w2.shape[0]
    n_pad = _round_up(n, LANE)

    # Fold: lin2(lin1(x)) = W2 @ (w1 * x + b1) + b2 = (W2 @ w1) * x + (W2 @ b1 + b2)
    a = jnp.dot(w2.astype(f32), w1.astype(f32),
                preferred_element_type=f32)              # (n, 1)
    c = jnp.dot(w2.astype(f32), b1.astype(f32),
                preferred_element_type=f32) + b2.astype(f32)   # (n,)

    a_p = jnp.zeros((n_pad, 1), f32).at[:n, :].set(a)
    c_p = jnp.zeros((n_pad, 1), f32).at[:n, 0].set(c)
    w3_p = jnp.zeros((8, n_pad), compute_dtype).at[0:1, :n].set(
        w3.astype(compute_dtype))
    b3_p = jnp.asarray(b3, f32).reshape((1,))
    return a_p, c_p, w3_p, b3_p


def mlp_forward(x, w1, b1, w2, b2, w3, b3, *,
                compute_dtype=jnp.bfloat16, tb=DEFAULT_TB):
    """Forward pass of the fused MLP.

    x: (B, 1) float32.  Weights/biases are in PyTorch layout:
      w1 (n,1), b1 (n,), w2 (n,n), b2 (n,), w3 (1,n), b3 (1,).
    compute_dtype: dtype of the single MXU matmul's inputs (accumulation is f32).
    """
    B = x.shape[0]
    assert x.ndim == 2 and x.shape[1] == 1, "expected (B, 1) input"
    assert tb % LANE == 0, "batch tile must be a multiple of 128 lanes"

    a_p, c_p, w3_p, b3_p = _prep_params(w1, b1, w2, b2, w3, b3, compute_dtype)
    n_pad = a_p.shape[0]

    b_pad = _round_up(B, tb)
    g = b_pad // tb

    # Batch on the lane axis, zero-padded to a multiple of the lane tile.
    # TODO(synk): callers could supply/consume the (1, b_pad) lane-major layout
    # directly to avoid this wrapper-side pad/slice at tiny batch sizes.
    x_lanes = jnp.pad(x[:, 0].astype(jnp.float32), (0, b_pad - B)).reshape(1, b_pad)

    out_lanes = pl.pallas_call(
        _mlp_kernel,
        out_shape=jax.ShapeDtypeStruct((1, b_pad), jnp.float32),
        grid_spec=pltpu.PrefetchScalarGridSpec(
            num_scalar_prefetch=0,
            grid=(g,),
            in_specs=[
                pl.BlockSpec((1, tb), lambda i: (0, i)),            # x (lane-dense)
                pl.BlockSpec((n_pad, 1), lambda i: (0, 0)),         # a = W2 @ w1
                pl.BlockSpec((n_pad, 1), lambda i: (0, 0)),         # c = W2 @ b1 + b2
                pl.BlockSpec((8, n_pad), lambda i: (0, 0)),         # w3 (row 0 real)
                pl.BlockSpec(memory_space=pltpu.MemorySpace.SMEM),  # b3 scalar
            ],
            out_specs=pl.BlockSpec((1, tb), lambda i: (0, i)),
        ),
        compiler_params=pltpu.CompilerParams(
            dimension_semantics=("parallel",),
            vmem_limit_bytes=32 * 1024 * 1024,
        ),
    )(x_lanes, a_p, c_p, w3_p, b3_p)

    return out_lanes[0, :B].reshape(B, 1)


def reference_forward(x, w1, b1, w2, b2, w3, b3):
    """Pure-JAX mirror of the PyTorch module (PyTorch (out, in) weight layout)."""
    h1 = x @ w1.T + b1
    h2 = jnp.tanh(h1 @ w2.T + b2)
    return jnp.tanh(h2 @ w3.T + b3)


def init_params(key, n=N):
    k1, k2, k3, k4, k5, k6 = jax.random.split(key, 6)
    w1 = jax.random.normal(k1, (n, 1), jnp.float32) * 0.5            # lin1.weight
    b1 = jax.random.normal(k2, (n,), jnp.float32) * 0.1              # lin1.bias
    w2 = jax.random.normal(k3, (n, n), jnp.float32) / jnp.sqrt(n)    # lin2.weight
    b2 = jax.random.normal(k4, (n,), jnp.float32) * 0.1              # lin2.bias
    w3 = jax.random.normal(k5, (1, n), jnp.float32) / jnp.sqrt(n)    # lin8.weight
    b3 = jax.random.normal(k6, (1,), jnp.float32) * 0.1              # lin8.bias
    return w1, b1, w2, b2, w3, b3


if __name__ == "__main__":
    key = jax.random.PRNGKey(0)
    kx, kp = jax.random.split(key)
    params = init_params(kp)

    # Small test batch (matches the module's (B, 1) input).
    B = 16
    x = jax.random.normal(kx, (B, 1), jnp.float32)
    ref = reference_forward(x, *params)

    # Near-exact path: f32 MXU inputs (fold is done in f32; tiny reassociation error).
    out_f32 = jax.block_until_ready(
        mlp_forward(x, *params, compute_dtype=jnp.float32))
    assert out_f32.shape == (B, 1)
    assert jnp.allclose(out_f32, ref, atol=1e-4, rtol=1e-4), "f32 kernel mismatch"

    # Production default: bf16 MXU inputs, f32 accumulation.
    out_bf16 = jax.block_until_ready(mlp_forward(x, *params))
    assert jnp.allclose(out_bf16, ref, atol=5e-2, rtol=5e-2), "bf16 kernel mismatch"

    # Multi-step grid + ragged batch-padding path (small tb to exercise the grid).
    B2 = 600
    x2 = jax.random.normal(kx, (B2, 1), jnp.float32)
    ref2 = reference_forward(x2, *params)
    out2 = jax.block_until_ready(
        mlp_forward(x2, *params, compute_dtype=jnp.float32, tb=256))
    assert out2.shape == (B2, 1)
    assert jnp.allclose(out2, ref2, atol=1e-4, rtol=1e-4), "multi-block mismatch"

    print("KERNEL_OK")
</pallas_src>

<mosaic_0001>
module attributes {stable_mosaic.version = 11 : i64} {
  func.func @_mlp_kernel(%arg0: i32, %arg1: memref<1x2048xf32, #tpu.memory_space<vmem>>, %arg2: memref<128x1xf32, #tpu.memory_space<vmem>>, %arg3: memref<128x1xf32, #tpu.memory_space<vmem>>, %arg4: memref<8x128xf32, #tpu.memory_space<vmem>>, %arg5: memref<1xf32, #tpu.memory_space<smem>>, %arg6: memref<1x2048xf32, #tpu.memory_space<vmem>>) attributes {dimension_semantics = [#tpu.dimension_semantics<parallel>], iteration_bounds = array<i64: 1>, scalar_prefetch = 0 : i64, scratch_operands = 0 : i64, tpu.core_type = #tpu.core_type<tc>, window_params = [{transform_indices = @transform_0, window_bounds = array<i64: 1, 2048>}, {pipeline_mode = #tpu.pipeline_mode<synchronous>, transform_indices = @transform_1, window_bounds = array<i64: 128, 1>}, {pipeline_mode = #tpu.pipeline_mode<synchronous>, transform_indices = @transform_2, window_bounds = array<i64: 128, 1>}, {pipeline_mode = #tpu.pipeline_mode<synchronous>, transform_indices = @transform_3, window_bounds = array<i64: 8, 128>}, {transform_indices = @transform_4, window_bounds = array<i64: 1>}, {transform_indices = @transform_5, window_bounds = array<i64: 1, 2048>}]} {
    %c0 = arith.constant 0 : index
    %c0_0 = arith.constant 0 : index
    %0 = vector.load %arg1[%c0, %c0_0] : memref<1x2048xf32, #tpu.memory_space<vmem>>, vector<1x2048xf32>
    %c0_1 = arith.constant 0 : index
    %c0_2 = arith.constant 0 : index
    %1 = vector.load %arg2[%c0_1, %c0_2] : memref<128x1xf32, #tpu.memory_space<vmem>>, vector<128x1xf32>
    %c0_3 = arith.constant 0 : index
    %c0_4 = arith.constant 0 : index
    %2 = vector.load %arg3[%c0_3, %c0_4] : memref<128x1xf32, #tpu.memory_space<vmem>>, vector<128x1xf32>
    %3 = vector.broadcast %1 : vector<128x1xf32> to vector<128x2048xf32>
    %4 = vector.broadcast %0 : vector<1x2048xf32> to vector<128x2048xf32>
    %5 = arith.mulf %3, %4 : vector<128x2048xf32>
    %6 = vector.broadcast %2 : vector<128x1xf32> to vector<128x2048xf32>
    %7 = arith.addf %5, %6 : vector<128x2048xf32>
    %8 = math.tanh %7 : vector<128x2048xf32>
    %c0_5 = arith.constant 0 : index
    %c0_6 = arith.constant 0 : index
    %9 = vector.load %arg4[%c0_5, %c0_6] : memref<8x128xf32, #tpu.memory_space<vmem>>, vector<8x128xf32>
    %cst = arith.constant dense<0.000000e+00> : vector<8x2048xf32>
    %10 = tpu.matmul %9, %8, %cst {dimension_numbers = #tpu.dot_dimension_numbers<[1], [0], [0], [1], [0, 0, 1, 1], [], []>} : vector<8x128xf32>, vector<128x2048xf32>, vector<8x2048xf32> -> vector<8x2048xf32>
    %11 = vector.extract_strided_slice %10 {offsets = [0, 0], sizes = [1, 2048], strides = [1, 1]} : vector<8x2048xf32> to vector<1x2048xf32>
    %c0_7 = arith.constant 0 : index
    %12 = memref.load %arg5[%c0_7] : memref<1xf32, #tpu.memory_space<smem>>
    %13 = vector.broadcast %12 : f32 to vector<1x2048xf32>
    %14 = arith.addf %11, %13 : vector<1x2048xf32>
    %15 = math.tanh %14 : vector<1x2048xf32>
    %c0_8 = arith.constant 0 : index
    %c0_9 = arith.constant 0 : index
    %16 = vector.load %arg6[%c0_8, %c0_9] : memref<1x2048xf32, #tpu.memory_space<vmem>>, vector<1x2048xf32>
    tpu.vector_store %arg6[%c0_8, %c0_9], %15 {strides = array<i32>} : memref<1x2048xf32, #tpu.memory_space<vmem>>, vector<1x2048xf32>,
    return
  }
  func.func @transform_0(%arg0: i32) -> (i32, i32) {
    %c0_i32 = arith.constant 0 : i32
    %c0_i32_0 = arith.constant 0 : i32
    return %c0_i32, %arg0 : i32, i32
  }
  func.func @transform_1(%arg0: i32) -> (i32, i32) {
    %c0_i32 = arith.constant 0 : i32
    %c0_i32_0 = arith.constant 0 : i32
    %c0_i32_1 = arith.constant 0 : i32
    return %c0_i32, %c0_i32_0 : i32, i32
  }
  func.func @transform_2(%arg0: i32) -> (i32, i32) {
    %c0_i32 = arith.constant 0 : i32
    %c0_i32_0 = arith.constant 0 : i32
    %c0_i32_1 = arith.constant 0 : i32
    return %c0_i32, %c0_i32_0 : i32, i32
  }
  func.func @transform_3(%arg0: i32) -> (i32, i32) {
    %c0_i32 = arith.constant 0 : i32
    %c0_i32_0 = arith.constant 0 : i32
    %c0_i32_1 = arith.constant 0 : i32
    return %c0_i32, %c0_i32_0 : i32, i32
  }
  func.func @transform_4(%arg0: i32) -> i32 {
    %c0_i32 = arith.constant 0 : i32
    %c0_i32_0 = arith.constant 0 : i32
    return %c0_i32 : i32
  }
  func.func @transform_5(%arg0: i32) -> (i32, i32) {
    %c0_i32 = arith.constant 0 : i32
    %c0_i32_0 = arith.constant 0 : i32
    return %c0_i32, %arg0 : i32, i32
  }
}

</mosaic_0001>

<bundles_post_ra>
// kernel: tpu_custom_call.1
= control target key start
LH: loop header
LB: loop body
LE: loop exit
PB: predicated region body
PF: predicated region fallthrough
CT: control target
= control target key end

     0   :  { %v2632_v2 = vmov 0   ;;  %s3754_s0 = inlined_call_operand.vmem [shape: f32[1,2048], index: 0, kind: input, shape index: {}]   ;;  %s3755_s1 = inlined_call_operand.vmem [shape: f32[128,1], index: 1, kind: input, shape index: {}]   ;;  %s3756_s2 = inlined_call_operand.vmem [shape: f32[128,1], index: 2, kind: input, shape index: {}]   ;;  %s3757_s3 = inlined_call_operand.vmem [shape: f32[8,128], index: 3, kind: input, shape index: {}]   ;;  %s3758_s4 = inlined_call_operand.<no memory space> [shape: f32[1], index: 4, kind: input, shape index: {}]   ;;  %s3759_s5 = inlined_call_operand.hbm [shape: f32[1,2048], index: 5, kind: output, shape index: {}]  }
   0x1   :  { %v40_v0 = vld [vmem:[%s3756_s2] sm:$0xff]  ;;  %2062 = vset.pattern.permute.xlu1 %v2632_v2  ;;  %2061 = vset.pattern.permute.xlu0 %v2632_v2  ;;  %v41_v3 = vld [vmem:[%s3756_s2 + $0x8] sm:$0xff]  ;;  %v27_v5 = vld [vmem:[%s3755_s1 + $0x18] sm:$0xff] }
   0x2   :  { %v24_v1 = vld [vmem:[%s3755_s1] sm:$0xff]  ;;  %476 = vperm.xlu1 %2062, %v40_v0   ;;  %v25_v4 = vld [vmem:[%s3755_s1 + $0x8] sm:$0xff]  ;;  %v26_v6 = vld [vmem:[%s3755_s1 + $0x10] sm:$0xff] }
   0x3   :  { %58 = vperm.xlu0 %2061, %v24_v1   ;;  %v43_v7 = vld [vmem:[%s3756_s2 + $0x18] sm:$0xff]  ;;  %v42_v8 = vld [vmem:[%s3756_s2 + $0x10] sm:$0xff] }
   0x6   :  { %481 = vperm.xlu1 %2062, %v41_v3  }
   0x7   :  { %63 = vperm.xlu0 %2061, %v25_v4  }
   0xa   :  { %73 = vperm.xlu1 %2062, %v27_v5  }
   0xb   :  { %68 = vperm.xlu0 %2061, %v26_v6  }
   0xc   :  { %11 = vsyncpa [#allocation4], 0  ;;  %v29_v9 = vld [vmem:[%s3755_s1 + $0x28] sm:$0xff]  ;;  %v28_v10 = vld [vmem:[%s3755_s1 + $0x20] sm:$0xff]  ;;  %v2633_v33 = vmov 0.0   ;;  %v138_v34 = vlaneseq }
   0xd   :  { %v45_v11 = vld [vmem:[%s3756_s2 + $0x28] sm:$0xff]  ;;  %v44_v12 = vld [vmem:[%s3756_s2 + $0x20] sm:$0xff]  ;;  %v31_v13 = vld [vmem:[%s3755_s1 + $0x38] sm:$0xff]  ;;  %1131 = vmatprep.mubr.f32.mxu0 %v2633_v33  ;;  %1202 = vmatprep.mubr.f32.mxu1 %v2633_v33 }
   0xe   :  { %491 = vperm.xlu1 %2062, %v43_v7   ;;  %v30_v14 = vld [vmem:[%s3755_s1 + $0x30] sm:$0xff]  ;;  %v47_v15 = vld [vmem:[%s3756_s2 + $0x38] sm:$0xff]  ;;  %v33_v17 = vld [vmem:[%s3755_s1 + $0x48] sm:$0xff]  ;;  %v2764_v35 = vshrl.u32 %v138_v34, 7 }
   0xf   :  { %486 = vperm.xlu0 %2061, %v42_v8   ;;  %v46_v16 = vld [vmem:[%s3756_s2 + $0x30] sm:$0xff]  ;;  %v32_v18 = vld [vmem:[%s3755_s1 + $0x40] sm:$0xff]  ;;  %v49_v19 = vld [vmem:[%s3756_s2 + $0x48] sm:$0xff] }
  0x10   :  { %v48_v20 = vld [vmem:[%s3756_s2 + $0x40] sm:$0xff]  ;;  %v35_v21 = vld [vmem:[%s3755_s1 + $0x58] sm:$0xff]  ;;  %v34_v22 = vld [vmem:[%s3755_s1 + $0x50] sm:$0xff]  ;;  %v144_v36 = vsub.s32 1, %v2764_v35  ;;  %v3764_v37 = vsub.s32 3, %v2764_v35  ;;  %v140_v38 = vsub.s32 0, %v2764_v35 }
  0x11   :  { %v51_v23 = vld [vmem:[%s3756_s2 + $0x58] sm:$0xff]  ;;  %v50_v24 = vld [vmem:[%s3756_s2 + $0x50] sm:$0xff]  ;;  %v37_v25 = vld [vmem:[%s3755_s1 + $0x68] sm:$0xff]  ;;  %v148_v39 = vsub.s32 2, %v2764_v35 }
  0x12   :  { %83 = vperm.xlu1 %2062, %v29_v9   ;;  %v36_v26 = vld [vmem:[%s3755_s1 + $0x60] sm:$0xff]  ;;  %v53_v27 = vld [vmem:[%s3756_s2 + $0x68] sm:$0xff]  ;;  %v39_v29 = vld [vmem:[%s3755_s1 + $0x78] sm:$0xff] }
  0x13   :  { %78 = vperm.xlu0 %2061, %v28_v10   ;;  %v52_v28 = vld [vmem:[%s3756_s2 + $0x60] sm:$0xff]  ;;  %v38_v30 = vld [vmem:[%s3755_s1 + $0x70] sm:$0xff]  ;;  %v55_v31 = vld [vmem:[%s3756_s2 + $0x78] sm:$0xff] }
  0x14   :  { %v54_v32 = vld [vmem:[%s3756_s2 + $0x70] sm:$0xff]  ;;  %v2773_v40 = vld [vmem:[%s3754_s0] sm:$0xff] }
  0x15   :  { %v2778_v41 = vrot.slane %v2773_v40, %v144_v36  ;;  %v2783_v42 = vrot.slane %v2773_v40, %v3764_v37  ;;  %v2788_v43 = vrot.slane %v2773_v40, %v140_v38  ;;  %v2793_v44 = vrot.slane %v2773_v40, %v148_v39 }
  0x16   :  { %501 = vperm.xlu1 %2062, %v45_v11  }
  0x17   :  { %496 = vperm.xlu0 %2061, %v44_v12  }
  0x1a   :  { %93 = vperm.xlu1 %2062, %v31_v13  }
  0x1b   :  { %88 = vperm.xlu0 %2061, %v30_v14  }
  0x1e   :  { %511 = vperm.xlu1 %2062, %v47_v15  }
  0x1f   :  { %506 = vperm.xlu0 %2061, %v46_v16  }
  0x22   :  { %103 = vperm.xlu1 %2062, %v33_v17  }
  0x23   :  { %98 = vperm.xlu0 %2061, %v32_v18  }
  0x26   :  { %521 = vperm.xlu1 %2062, %v49_v19  }
  0x27   :  { %516 = vperm.xlu0 %2061, %v48_v20  }
  0x2a   :  { %113 = vperm.xlu1 %2062, %v35_v21  }
  0x2b   :  { %108 = vperm.xlu0 %2061, %v34_v22  }
  0x2e   :  { %531 = vperm.xlu1 %2062, %v51_v23  }
  0x2f   :  { %526 = vperm.xlu0 %2061, %v50_v24  }
  0x32   :  { %123 = vperm.xlu1 %2062, %v37_v25  }
  0x33   :  { %118 = vperm.xlu0 %2061, %v36_v26  }
  0x36   :  { %541 = vperm.xlu1 %2062, %v53_v27  }
  0x37   :  { %536 = vperm.xlu0 %2061, %v52_v28  }
  0x3a   :  { %133 = vperm.xlu1 %2062, %v39_v29  }
  0x3b   :  { %128 = vperm.xlu0 %2061, %v38_v30  }
  0x3e   :  { %551 = vperm.xlu1 %2062, %v55_v31  }
  0x3f   :  { %546 = vperm.xlu0 %2061, %v54_v32  }
  0x81   :  { %v2795_v45 = vpop.permute.xlu1 %476 }
  0x82   :  { %v2797_v46 = vpop.permute.xlu0 %58 }
  0x83   :  { %v219_v47 = vmul.f32 %v2778_v41, %v2797_v46  ;;  %v221_v48 = vmul.f32 %v2783_v42, %v2797_v46  ;;  %v218_v49 = vmul.f32 %v2788_v43, %v2797_v46  ;;  %v220_v50 = vmul.f32 %v2793_v44, %v2797_v46 }
  0x85   :  { %v555_v51 = vadd.f32 %v2795_v45, %v219_v47  ;;  %v557_v52 = vadd.f32 %v2795_v45, %v221_v48  ;;  %v554_v53 = vadd.f32 %v2795_v45, %v218_v49  ;;  %v2810_v54 = vpop.permute.xlu1 %481  ;;  %v556_v56 = vadd.f32 %v2795_v45, %v220_v50 }
  0x86   :  { %v2812_v55 = vpop.permute.xlu0 %63 }
  0x87   :  { %v235_v57 = vmul.f32 %v2778_v41, %v2812_v55  ;;  %2063 = vtanh.f32 %v555_v51  ;;  %v237_v58 = vmul.f32 %v2783_v42, %v2812_v55  ;;  %v234_v59 = vmul.f32 %v2788_v43, %v2812_v55 }
  0x88   :  { %2065 = vtanh.f32 %v557_v52  ;;  %v236_v60 = vmul.f32 %v2793_v44, %v2812_v55 }
  0x89   :  { %v571_v61 = vadd.f32 %v2810_v54, %v235_v57  ;;  %v573_v62 = vadd.f32 %v2810_v54, %v237_v58  ;;  %v570_v63 = vadd.f32 %v2810_v54, %v234_v59  ;;  %2067 = vtanh.f32 %v554_v53  ;;  %v2826_v0 = vpop.permute.xlu1 %73 }
  0x8a   :  { %v2828_v1 = vpop.permute.xlu0 %68  ;;  %v572_v2 = vadd.f32 %v2810_v54, %v236_v60  ;;  %2069 = vtanh.f32 %v556_v56  ;;  %v267_v4 = vmul.f32 %v2778_v41, %v2826_v0  ;;  %v269_v8 = vmul.f32 %v2783_v42, %v2826_v0 }
  0x8b   :  { %2071 = vtanh.f32 %v571_v61  ;;  %v251_v3 = vmul.f32 %v2778_v41, %v2828_v1  ;;  %v253_v5 = vmul.f32 %v2783_v42, %v2828_v1  ;;  %v250_v12 = vmul.f32 %v2788_v43, %v2828_v1 }
  0x8c   :  { %2073 = vtanh.f32 %v573_v62  ;;  %v266_v14 = vmul.f32 %v2788_v43, %v2826_v0  ;;  %v252_v17 = vmul.f32 %v2793_v44, %v2828_v1  ;;  %v268_v22 = vmul.f32 %v2793_v44, %v2826_v0 }
  0x8d   :  { %2075 = vtanh.f32 %v570_v63  ;;  %v2837_v6 = vpop.permute.xlu1 %491 }
  0x8e   :  { %v2839_v7 = vpop.permute.xlu0 %486  ;;  %2077 = vtanh.f32 %v572_v2  ;;  %v603_v10 = vadd.f32 %v2837_v6, %v267_v4  ;;  %v605_v13 = vadd.f32 %v2837_v6, %v269_v8  ;;  %v602_v21 = vadd.f32 %v2837_v6, %v266_v14 }
  0x8f   :  { %v587_v9 = vadd.f32 %v2839_v7, %v251_v3  ;;  %v589_v11 = vadd.f32 %v2839_v7, %v253_v5  ;;  %v586_v16 = vadd.f32 %v2839_v7, %v250_v12  ;;  %v588_v24 = vadd.f32 %v2839_v7, %v252_v17 }
  0x90   :  { %v604_v26 = vadd.f32 %v2837_v6, %v268_v22 }
  0x91   :  { %v2064_v15 = vpop.eup %2063  ;;  %2079 = vtanh.f32 %v587_v9  ;;  %v2854_v19 = vpop.permute.xlu1 %83 }
  0x92   :  { %v2066_v18 = vpop.eup %2065  ;;  %v2856_v20 = vpop.permute.xlu0 %78  ;;  %2081 = vtanh.f32 %v603_v10  ;;  %v299_v29 = vmul.f32 %v2778_v41, %v2854_v19  ;;  %v301_v31 = vmul.f32 %v2783_v42, %v2854_v19  ;;  %v298_v50 = vmul.f32 %v2788_v43, %v2854_v19 }
  0x93   :  { %v2068_v23 = vpop.eup %2067  ;;  %2083 = vtanh.f32 %v589_v11  ;;  %v283_v27 = vmul.f32 %v2778_v41, %v2856_v20  ;;  %v285_v30 = vmul.f32 %v2783_v42, %v2856_v20  ;;  %v282_v49 = vmul.f32 %v2788_v43, %v2856_v20 }
  0x94   :  { %v2070_v25 = vpop.eup %2069  ;;  %2085 = vtanh.f32 %v605_v13  ;;  %v284_v63 = vmul.f32 %v2793_v44, %v2856_v20  ;;  %v300_v5 = vmul.f32 %v2793_v44, %v2854_v19 }
  0x95   :  { %v2072_v28 = vpop.eup %2071  ;;  %2087 = vtanh.f32 %v586_v16  ;;  %v2871_v34 = vpop.permute.xlu1 %501 }
  0x96   :  { %v2074_v32 = vpop.eup %2073  ;;  %v2873_v47 = vpop.permute.xlu0 %496  ;;  %v1801_v48 = vpack.c.bf16 %v2072_v28, %v2064_v15  ;;  %2089 = vtanh.f32 %v602_v21  ;;  %v635_v56 = vadd.f32 %v2871_v34, %v299_v29  ;;  %v637_v60 = vadd.f32 %v2871_v34, %v301_v31 }
  0x97   :  { %v2076_v51 = vpop.eup %2075  ;;  %v1833_v52 = vpack.c.bf16 %v2074_v32, %v2066_v18  ;;  %2091 = vtanh.f32 %v588_v24  ;;  %v619_v53 = vadd.f32 %v2873_v47, %v283_v27  ;;  %v621_v59 = vadd.f32 %v2873_v47, %v285_v30 }
  0x98   :  { %v2078_v57 = vpop.eup %2077  ;;  %1802 = vmatprep.subr.bf16.mxu0 %v1801_v48  ;;  %v1803_v58 = vpack.c.bf16 %v2076_v51, %v2068_v23  ;;  %2093 = vtanh.f32 %v604_v26  ;;  %v618_v62 = vadd.f32 %v2873_v47, %v282_v49  ;;  %v634_v4 = vadd.f32 %v2871_v34, %v298_v50 }
  0x99   :  { %1834 = vmatprep.subr.bf16.mxu1 %v1833_v52  ;;  %v1835_v61 = vpack.c.bf16 %v2078_v57, %v2070_v25  ;;  %2095 = vtanh.f32 %v619_v53  ;;  %v2886_v2 = vpop.permute.xlu1 %93  ;;  %v620_v9 = vadd.f32 %v2873_v47, %v284_v63  ;;  %v636_v11 = vadd.f32 %v2871_v34, %v300_v5 }
  0x9a   :  { %1804 = vmatpush1.bf16.msra.mxu0 %v1803_v58  ;;  %v2888_v3 = vpop.permute.xlu0 %88  ;;  %2097 = vtanh.f32 %v635_v56  ;;  %v331_v15 = vmul.f32 %v2778_v41, %v2886_v2  ;;  %v333_v22 = vmul.f32 %v2783_v42, %v2886_v2  ;;  %v330_v31 = vmul.f32 %v2788_v43, %v2886_v2 }
  0x9b   :  { %v2080_v8 = vpop.eup %2079  ;;  %1836 = vmatpush1.bf16.msra.mxu1 %v1835_v61  ;;  %2099 = vtanh.f32 %v621_v59  ;;  %v315_v14 = vmul.f32 %v2778_v41, %v2888_v3  ;;  %v317_v21 = vmul.f32 %v2783_v42, %v2888_v3  ;;  %v314_v23 = vmul.f32 %v2788_v43, %v2888_v3 }
  0x9c   :  { %v2082_v10 = vpop.eup %2081  ;;  %2101 = vtanh.f32 %v637_v60  ;;  %v316_v50 = vmul.f32 %v2793_v44, %v2888_v3  ;;  %v332_v57 = vmul.f32 %v2793_v44, %v2886_v2 }
  0x9d   :  { %v2084_v12 = vpop.eup %2083  ;;  %v1805_v13 = vpack.c.bf16 %v2082_v10, %v2080_v8  ;;  %2103 = vtanh.f32 %v618_v62  ;;  %v2899_v17 = vpop.permute.xlu1 %511 }
  0x9e   :  { %v2086_v16 = vpop.eup %2085  ;;  %v2901_v18 = vpop.permute.xlu0 %506  ;;  %2105 = vtanh.f32 %v634_v4  ;;  %v667_v27 = vadd.f32 %v2899_v17, %v331_v15  ;;  %v669_v30 = vadd.f32 %v2899_v17, %v333_v22  ;;  %v666_v56 = vadd.f32 %v2899_v17, %v330_v31 }
  0x9f   :  { %v2088_v24 = vpop.eup %2087  ;;  %1806 = vmatprep.subr.bf16.mxu0 %v1805_v13  ;;  %v1837_v25 = vpack.c.bf16 %v2086_v16, %v2084_v12  ;;  %2107 = vtanh.f32 %v620_v9  ;;  %v651_v26 = vadd.f32 %v2901_v18, %v315_v14  ;;  %v653_v29 = vadd.f32 %v2901_v18, %v317_v21 }
  0xa0   :  { %v2090_v28 = vpop.eup %2089  ;;  %2109 = vtanh.f32 %v636_v11  ;;  %v650_v49 = vadd.f32 %v2901_v18, %v314_v23  ;;  %v652_v60 = vadd.f32 %v2901_v18, %v316_v50  ;;  %v668_v62 = vadd.f32 %v2899_v17, %v332_v57 }
  0xa1   :  { %v2092_v32 = vpop.eup %2091  ;;  %1838 = vmatprep.subr.bf16.mxu1 %v1837_v25  ;;  %v1807_v48 = vpack.c.bf16 %v2090_v28, %v2088_v24  ;;  %2111 = vtanh.f32 %v651_v26  ;;  %v2918_v52 = vpop.permute.xlu1 %103 }
  0xa2   :  { %v2094_v51 = vpop.eup %2093  ;;  %v2920_v53 = vpop.permute.xlu0 %98  ;;  %2113 = vtanh.f32 %v667_v27  ;;  %v363_v8 = vmul.f32 %v2778_v41, %v2918_v52  ;;  %v365_v13 = vmul.f32 %v2783_v42, %v2918_v52  ;;  %v362_v26 = vmul.f32 %v2788_v43, %v2918_v52 }
  0xa3   :  { %v2096_v58 = vpop.eup %2095  ;;  %1808 = vmatpush1.bf16.msra.mxu0 %v1807_v48  ;;  %v1839_v59 = vpack.c.bf16 %v2094_v51, %v2092_v32  ;;  %2115 = vtanh.f32 %v653_v29  ;;  %v347_v5 = vmul.f32 %v2778_v41, %v2920_v53  ;;  %v349_v12 = vmul.f32 %v2783_v42, %v2920_v53 }
  0xa4   :  { %v2098_v61 = vpop.eup %2097  ;;  %2117 = vtanh.f32 %v669_v30  ;;  %v346_v14 = vmul.f32 %v2788_v43, %v2920_v53  ;;  %v348_v30 = vmul.f32 %v2793_v44, %v2920_v53  ;;  %v364_v50 = vmul.f32 %v2793_v44, %v2918_v52 }
  0xa5   :  { %v2100_v63 = vpop.eup %2099  ;;  %1840 = vmatpush1.bf16.msra.mxu1 %v1839_v59  ;;  %v1809_v4 = vpack.c.bf16 %v2098_v61, %v2096_v58  ;;  %2119 = vtanh.f32 %v650_v49  ;;  %v2931_v10 = vpop.permute.xlu1 %521 }
  0xa6   :  { %v2102_v9 = vpop.eup %2101  ;;  %v2933_v11 = vpop.permute.xlu0 %516  ;;  %2121 = vtanh.f32 %v666_v56  ;;  %v699_v22 = vadd.f32 %v2931_v10, %v363_v8  ;;  %v701_v25 = vadd.f32 %v2931_v10, %v365_v13  ;;  %v698_v49 = vadd.f32 %v2931_v10, %v362_v26 }
  0xa7   :  { %v2104_v15 = vpop.eup %2103  ;;  %1810 = vmatprep.subr.bf16.mxu0 %v1809_v4  ;;  %v1841_v16 = vpack.c.bf16 %v2102_v9, %v2100_v63  ;;  %2123 = vtanh.f32 %v652_v60  ;;  %v683_v21 = vadd.f32 %v2933_v11, %v347_v5  ;;  %v685_v24 = vadd.f32 %v2933_v11, %v349_v12 }
  0xa8   :  { %v2106_v23 = vpop.eup %2105  ;;  %2125 = vtanh.f32 %v668_v62  ;;  %v682_v29 = vadd.f32 %v2933_v11, %v346_v14  ;;  %v684_v57 = vadd.f32 %v2933_v11, %v348_v30  ;;  %v700_v59 = vadd.f32 %v2931_v10, %v364_v50 }
  0xa9   :  { %v2108_v27 = vpop.eup %2107  ;;  %1842 = vmatprep.subr.bf16.mxu1 %v1841_v16  ;;  %v1811_v28 = vpack.c.bf16 %v2106_v23, %v2104_v15  ;;  %2127 = vtanh.f32 %v683_v21  ;;  %v2950_v32 = vpop.permute.xlu1 %113  ;;  %v3763_v60 = vsub.s32 5, %v2764_v35 }
  0xaa   :  { %v2110_v31 = vpop.eup %2109  ;;  %v2952_v48 = vpop.permute.xlu0 %108  ;;  %2129 = vtanh.f32 %v699_v22  ;;  %v395_v4 = vmul.f32 %v2778_v41, %v2950_v32  ;;  %v397_v13 = vmul.f32 %v2783_v42, %v2950_v32  ;;  %v394_v26 = vmul.f32 %v2788_v43, %v2950_v32 }
  0xab   :  { %v2112_v51 = vpop.eup %2111  ;;  %1812 = vmatpush1.bf16.msra.mxu0 %v1811_v28  ;;  %v1843_v56 = vpack.c.bf16 %v2110_v31, %v2108_v27  ;;  %2131 = vtanh.f32 %v685_v24  ;;  %v379_v63 = vmul.f32 %v2778_v41, %v2952_v48  ;;  %v381_v12 = vmul.f32 %v2783_v42, %v2952_v48 }
  0xac   :  { %v2114_v58 = vpop.eup %2113  ;;  %2133 = vtanh.f32 %v701_v25  ;;  %v378_v14 = vmul.f32 %v2788_v43, %v2952_v48  ;;  %v380_v30 = vmul.f32 %v2793_v44, %v2952_v48 }
  0xad   :  { %v2116_v61 = vpop.eup %2115  ;;  %1844 = vmatpush1.bf16.msra.mxu1 %v1843_v56  ;;  %v1813_v62 = vpack.c.bf16 %v2114_v58, %v2112_v51  ;;  %2135 = vtanh.f32 %v682_v29  ;;  %v2964_v8 = vpop.permute.xlu1 %531  ;;  %v396_v56 = vmul.f32 %v2793_v44, %v2950_v32 }
  0xae   :  { %v2118_v5 = vpop.eup %2117  ;;  %v2966_v9 = vpop.permute.xlu0 %526  ;;  %2137 = vtanh.f32 %v698_v49  ;;  %v731_v22 = vadd.f32 %v2964_v8, %v395_v4  ;;  %v733_v25 = vadd.f32 %v2964_v8, %v397_v13  ;;  %v730_v51 = vadd.f32 %v2964_v8, %v394_v26 }
  0xaf   :  { %v2120_v15 = vpop.eup %2119  ;;  %1814 = vmatprep.subr.bf16.mxu0 %v1813_v62  ;;  %v1845_v16 = vpack.c.bf16 %v2118_v5, %v2116_v61  ;;  %2139 = vtanh.f32 %v684_v57  ;;  %v715_v21 = vadd.f32 %v2966_v9, %v379_v63  ;;  %v717_v24 = vadd.f32 %v2966_v9, %v381_v12 }
  0xb0   :  { %v2122_v23 = vpop.eup %2121  ;;  %2141 = vtanh.f32 %v700_v59  ;;  %v714_v29 = vadd.f32 %v2966_v9, %v378_v14  ;;  %v2993_v57 = vrot.slane %v2773_v40, %v3763_v60  ;;  %v716_v61 = vadd.f32 %v2966_v9, %v380_v30 }
  0xb1   :  { %v2124_v27 = vpop.eup %2123  ;;  %1846 = vmatprep.subr.bf16.mxu1 %v1845_v16  ;;  %v1815_v28 = vpack.c.bf16 %v2122_v23, %v2120_v15  ;;  %2143 = vtanh.f32 %v715_v21  ;;  %v2983_v49 = vpop.permute.xlu1 %123  ;;  %v3762_v62 = vsub.s32 7, %v2764_v35  ;;  %v732_v4 = vadd.f32 %v2964_v8, %v396_v56 }
  0xb2   :  { %v2126_v31 = vpop.eup %2125  ;;  %v2985_v50 = vpop.permute.xlu0 %118  ;;  %2145 = vtanh.f32 %v731_v22  ;;  %v3761_v5 = vsub.s32 4, %v2764_v35  ;;  %v3760_v12 = vsub.s32 6, %v2764_v35  ;;  %v427_v16 = vmul.f32 %v2778_v41, %v2983_v49 }
  0xb3   :  { %v2128_v58 = vpop.eup %2127  ;;  %1816 = vmatpush1.bf16.msra.mxu0 %v1815_v28  ;;  %v1847_v59 = vpack.c.bf16 %v2126_v31, %v2124_v27  ;;  %2147 = vtanh.f32 %v717_v24  ;;  %v411_v15 = vmul.f32 %v2778_v41, %v2985_v50  ;;  %v413_v24 = vmul.f32 %v2783_v42, %v2985_v50 }
  0xb4   :  { %v2130_v63 = vpop.eup %2129  ;;  %2149 = vtanh.f32 %v733_v25  ;;  %v429_v25 = vmul.f32 %v2783_v42, %v2983_v49  ;;  %v410_v26 = vmul.f32 %v2788_v43, %v2985_v50 }
  0xb5   :  { %v2132_v13 = vpop.eup %2131  ;;  %1848 = vmatpush1.bf16.msra.mxu1 %v1847_v59  ;;  %v1817_v14 = vpack.c.bf16 %v2130_v63, %v2128_v58  ;;  %2151 = vtanh.f32 %v714_v29  ;;  %v3004_v22 = vpop.permute.xlu1 %541  ;;  %v426_v58 = vmul.f32 %v2788_v43, %v2983_v49 }
  0xb6   :  { %v2134_v21 = vpop.eup %2133  ;;  %v3006_v23 = vpop.permute.xlu0 %536  ;;  %2153 = vtanh.f32 %v730_v51  ;;  %v763_v30 = vadd.f32 %v3004_v22, %v427_v16  ;;  %v765_v56 = vadd.f32 %v3004_v22, %v429_v25 }
  0xb7   :  { %v2136_v27 = vpop.eup %2135  ;;  %1818 = vmatprep.subr.bf16.mxu0 %v1817_v14  ;;  %v1849_v28 = vpack.c.bf16 %v2134_v21, %v2132_v13  ;;  %2155 = vtanh.f32 %v716_v61  ;;  %v747_v29 = vadd.f32 %v3006_v23, %v411_v15  ;;  %v749_v51 = vadd.f32 %v3006_v23, %v413_v24 }
  0xb8   :  { %v2138_v31 = vpop.eup %2137  ;;  %2157 = vtanh.f32 %v732_v4  ;;  %v746_v13 = vadd.f32 %v3006_v23, %v410_v26  ;;  %v412_v61 = vmul.f32 %v2793_v44, %v2985_v50  ;;  %v762_v16 = vadd.f32 %v3004_v22, %v426_v58 }
  0xb9   :  { %v2140_v59 = vpop.eup %2139  ;;  %1850 = vmatprep.subr.bf16.mxu1 %v1849_v28  ;;  %v1819_v63 = vpack.c.bf16 %v2138_v31, %v2136_v27  ;;  %2159 = vtanh.f32 %v747_v29  ;;  %v3023_v15 = vpop.permute.xlu1 %133  ;;  %v428_v21 = vmul.f32 %v2793_v44, %v2983_v49  ;;  %v3033_v24 = vrot.slane %v2773_v40, %v3762_v62 }
  0xba   :  { %v2142_v14 = vpop.eup %2141  ;;  %v3025_v4 = vpop.permute.xlu0 %128  ;;  %2161 = vtanh.f32 %v763_v30  ;;  %v748_v27 = vadd.f32 %v3006_v23, %v412_v61  ;;  %v3039_v28 = vrot.slane %v2773_v40, %v3761_v5  ;;  %v223_v31 = vmul.f32 %v2993_v57, %v2797_v46 }
  0xbb   :  { %v2144_v25 = vpop.eup %2143  ;;  %1820 = vmatpush1.bf16.msra.mxu0 %v1819_v63  ;;  %v1851_v26 = vpack.c.bf16 %v2142_v14, %v2140_v59  ;;  %2163 = vtanh.f32 %v749_v51  ;;  %v764_v30 = vadd.f32 %v3004_v22, %v428_v21  ;;  %v3047_v58 = vrot.slane %v2773_v40, %v3760_v12 }
  0xbc   :  { %v2146_v29 = vpop.eup %2145  ;;  %2165 = vtanh.f32 %v765_v56  ;;  %v443_v63 = vmul.f32 %v2778_v41, %v3025_v4  ;;  %v459_v56 = vmul.f32 %v2778_v41, %v3023_v15  ;;  %v445_v40 = vmul.f32 %v2783_v42, %v3025_v4 }
  0xbd   :  { %v2148_v51 = vpop.eup %2147  ;;  %1852 = vmatpush1.bf16.msra.mxu1 %v1851_v26  ;;  %v1821_v59 = vpack.c.bf16 %v2146_v29, %v2144_v25  ;;  %2167 = vtanh.f32 %v746_v13  ;;  %v3053_v14 = vpop.permute.xlu1 %551  ;;  %v461_v26 = vmul.f32 %v2783_v42, %v3023_v15  ;;  %v442_v13 = vmul.f32 %v2788_v43, %v3025_v4 }
  0xbe   :  { %v2150_v61 = vpop.eup %2149  ;;  %v3055_v21 = vpop.permute.xlu0 %546  ;;  %2169 = vtanh.f32 %v762_v16  ;;  %v795_v12 = vadd.f32 %v3053_v14, %v459_v56  ;;  %v458_v42 = vmul.f32 %v2788_v43, %v3023_v15  ;;  %v239_v56 = vmul.f32 %v2993_v57, %v2812_v55 }
  0xbf   :  { %v2152_v25 = vpop.eup %2151  ;;  %1822 = vmatprep.subr.bf16.mxu0 %v1821_v59  ;;  %v1853_v29 = vpack.c.bf16 %v2150_v61, %v2148_v51  ;;  %2171 = vtanh.f32 %v748_v27  ;;  %v779_v41 = vadd.f32 %v3055_v21, %v443_v63  ;;  %v781_v16 = vadd.f32 %v3055_v21, %v445_v40 }
  0xc0   :  { %v2154_v5 = vpop.eup %2153  ;;  %2173 = vtanh.f32 %v764_v30  ;;  %v797_v62 = vadd.f32 %v3053_v14, %v461_v26  ;;  %v778_v51 = vadd.f32 %v3055_v21, %v442_v13  ;;  %v444_v27 = vmul.f32 %v2793_v44, %v3025_v4 }
  0xc1   :  { %v2156_v60 = vpop.eup %2155  ;;  %1854 = vmatprep.subr.bf16.mxu1 %v1853_v29  ;;  %v1823_v37 = vpack.c.bf16 %v2154_v5, %v2152_v25  ;;  %2175 = vtanh.f32 %v779_v41  ;;  %v794_v30 = vadd.f32 %v3053_v14, %v458_v42  ;;  %v460_v63 = vmul.f32 %v2793_v44, %v3023_v15 }
  0xc2   :  { %v2158_v59 = vpop.eup %2157  ;;  %2177 = vtanh.f32 %v795_v12  ;;  %v780_v5 = vadd.f32 %v3055_v21, %v444_v27  ;;  %v225_v40 = vmul.f32 %v3033_v24, %v2797_v46  ;;  %v241_v13 = vmul.f32 %v3033_v24, %v2812_v55 }
  0xc3   :  { %v2160_v43 = vpop.eup %2159  ;;  %1824 = vmatpush1.bf16.msra.mxu0 %v1823_v37  ;;  %v1855_v61 = vpack.c.bf16 %v2158_v59, %v2156_v60  ;;  %2179 = vtanh.f32 %v781_v16  ;;  %v796_v12 = vadd.f32 %v3053_v14, %v460_v63  ;;  %v559_v37 = vadd.f32 %v2795_v45, %v223_v31 }
  0xc4   :  { %v2162_v26 = vpop.eup %2161  ;;  %2181 = vtanh.f32 %v797_v62  ;;  %v222_v60 = vmul.f32 %v3039_v28, %v2797_v46  ;;  %v575_v41 = vadd.f32 %v2810_v54, %v239_v56  ;;  %v238_v62 = vmul.f32 %v3039_v28, %v2812_v55 }
  0xc5   :  { %v2164_v44 = vpop.eup %2163  ;;  %1856 = vmatpush1.bf16.msra.mxu1 %v1855_v61  ;;  %v1825_v25 = vpack.c.bf16 %v2162_v26, %v2160_v43  ;;  %2183 = vtanh.f32 %v778_v51  ;;  %v561_v27 = vadd.f32 %v2795_v45, %v225_v40  ;;  %v224_v51 = vmul.f32 %v3047_v58, %v2797_v46 }
  0xc6   :  { %v2166_v29 = vpop.eup %2165  ;;  %2185 = vtanh.f32 %v794_v30  ;;  %v577_v59 = vadd.f32 %v2810_v54, %v241_v13  ;;  %v240_v30 = vmul.f32 %v3047_v58, %v2812_v55  ;;  %v558_v43 = vadd.f32 %v2795_v45, %v222_v60 }
  0xc7   :  { %v2168_v16 = vpop.eup %2167  ;;  %1826 = vmatprep.subr.bf16.mxu0 %v1825_v25  ;;  %v1857_v42 = vpack.c.bf16 %v2166_v29, %v2164_v44  ;;  %2187 = vtanh.f32 %v780_v5  ;;  %v574_v5 = vadd.f32 %v2810_v54, %v238_v62  ;;  %v255_v13 = vmul.f32 %v2993_v57, %v2828_v1 }
  0xc8   :  { %v2170_v31 = vpop.eup %2169  ;;  %2189 = vtanh.f32 %v796_v12  ;;  %v560_v12 = vadd.f32 %v2795_v45, %v224_v51  ;;  %v576_v25 = vadd.f32 %v2810_v54, %v240_v30  ;;  %v257_v62 = vmul.f32 %v3033_v24, %v2828_v1 }
  0xc9   :  { %v2172_v63 = vpop.eup %2171  ;;  %1858 = vmatprep.subr.bf16.mxu1 %v1857_v42  ;;  %v1827_v56 = vpack.c.bf16 %v2170_v31, %v2168_v16  ;;  %2191 = vtanh.f32 %v559_v37  ;;  %v271_v37 = vmul.f32 %v2993_v57, %v2826_v0  ;;  %v254_v30 = vmul.f32 %v3039_v28, %v2828_v1 }
  0xca   :  { %v2174_v61 = vpop.eup %2173  ;;  %2193 = vtanh.f32 %v575_v41  ;;  %v591_v41 = vadd.f32 %v2839_v7, %v255_v13 }
  0xcb   :  { %v2176_v40 = vpop.eup %2175  ;;  %1828 = vmatpush1.bf16.msra.mxu0 %v1827_v56  ;;  %v1859_v26 = vpack.c.bf16 %v2174_v61, %v2172_v63  ;;  %2195 = vtanh.f32 %v561_v27  ;;  %v607_v42 = vadd.f32 %v2837_v6, %v271_v37  ;;  %v273_v27 = vmul.f32 %v3033_v24, %v2826_v0 }
  0xcc   :  { %v2178_v44 = vpop.eup %2177  ;;  %2197 = vtanh.f32 %v577_v59  ;;  %v593_v59 = vadd.f32 %v2839_v7, %v257_v62 }
  0xcd   :  { %v2180_v60 = vpop.eup %2179  ;;  %1860 = vmatpush1.bf16.msra.mxu1 %v1859_v26  ;;  %v1829_v29 = vpack.c.bf16 %v2178_v44, %v2176_v40  ;;  %2199 = vtanh.f32 %v558_v43  ;;  %v609_v56 = vadd.f32 %v2837_v6, %v273_v27  ;;  %v270_v43 = vmul.f32 %v3039_v28, %v2826_v0 }
  0xce   :  { %v2182_v16 = vpop.eup %2181  ;;  %2201 = vtanh.f32 %v574_v5  ;;  %v590_v40 = vadd.f32 %v2839_v7, %v254_v30  ;;  %v256_v26 = vmul.f32 %v3047_v58, %v2828_v1  ;;  %v272_v44 = vmul.f32 %v3047_v58, %v2826_v0 }
  0xcf   :  { %v2184_v51 = vpop.eup %2183  ;;  %1830 = vmatprep.subr.bf16.mxu0 %v1829_v29  ;;  %v1861_v31 = vpack.c.bf16 %v2182_v16, %v2180_v60  ;;  %2203 = vtanh.f32 %v560_v12  ;;  %v606_v13 = vadd.f32 %v2837_v6, %v270_v43  ;;  %v3124_v60 = vld [vmem:[%s3757_s3] sm:$0xff] }
  0xd0   :  { %v2186_v63 = vpop.eup %2185  ;;  %2205 = vtanh.f32 %v576_v25  ;;  %v592_v29 = vadd.f32 %v2839_v7, %v256_v26  ;;  %v608_v16 = vadd.f32 %v2837_v6, %v272_v44 }
  0xd1   :  { %v2188_v61 = vpop.eup %2187  ;;  %1862 = vmatprep.subr.bf16.mxu1 %v1861_v31  ;;  %v1831_v5 = vpack.c.bf16 %v2186_v63, %v2184_v51  ;;  %2207 = vtanh.f32 %v591_v41  ;;  %v287_v41 = vmul.f32 %v2993_v57, %v2856_v20 }
  0xd2   :  { %v2190_v12 = vpop.eup %2189  ;;  %2209 = vtanh.f32 %v607_v42  ;;  %v303_v42 = vmul.f32 %v2993_v57, %v2854_v19 }
  0xd3   :  { %v2192_v25 = vpop.eup %2191  ;;  %1832 = vmatpush1.bf16.msra.mxu0 %v1831_v5  ;;  %v1863_v37 = vpack.c.bf16 %v2190_v12, %v2188_v61  ;;  %2211 = vtanh.f32 %v593_v59  ;;  %v623_v31 = vadd.f32 %v2873_v47, %v287_v41  ;;  %v289_v59 = vmul.f32 %v3033_v24, %v2856_v20 }
  0xd4   :  { %v2194_v62 = vpop.eup %2193  ;;  %2213 = vtanh.f32 %v609_v56  ;;  %v639_v63 = vadd.f32 %v2871_v34, %v303_v42  ;;  %v305_v56 = vmul.f32 %v3033_v24, %v2854_v19 }
  0xd5   :  { %v2196_v27 = vpop.eup %2195  ;;  %1864 = vmatpush1.bf16.msra.mxu1 %v1863_v37  ;;  %v1865_v51 = vpack.c.bf16 %v2194_v62, %v2192_v25  ;;  %2215 = vtanh.f32 %v590_v40  ;;  %v625_v5 = vadd.f32 %v2873_v47, %v289_v59  ;;  %v286_v40 = vmul.f32 %v3039_v28, %v2856_v20 }
  0xd6   :  { %v2198_v30 = vpop.eup %2197  ;;  %1132 = vmatmul.mubr.f32.vlgmr.msra.gmra.mrb[0].mxu0 %v3124_v60  ;;  %2217 = vtanh.f32 %v606_v13  ;;  %v641_v12 = vadd.f32 %v2871_v34, %v305_v56  ;;  %v302_v13 = vmul.f32 %v3039_v28, %v2854_v19 }
  0xd7   :  { %v2200_v43 = vpop.eup %2199  ;;  %1866 = vmatprep.subr.bf16.mxu0 %v1865_v51  ;;  %v1897_v61 = vpack.c.bf16 %v2198_v30, %v2196_v27  ;;  %2219 = vtanh.f32 %v592_v29  ;;  %1273 = vmatprep.mubr.f32.mxu0 %v2633_v33  ;;  %v622_v37 = vadd.f32 %v2873_v47, %v286_v40  ;;  %v288_v29 = vmul.f32 %v3047_v58, %v2856_v20 }
  0xd8   :  { %v2202_v26 = vpop.eup %2201  ;;  %1203 = vmatmul.mubr.f32.vlgmr.msra.gmra.mrb[0].mxu1 %v3124_v60  ;;  %2221 = vtanh.f32 %v608_v16  ;;  %v638_v62 = vadd.f32 %v2871_v34, %v302_v13  ;;  %v304_v16 = vmul.f32 %v3047_v58, %v2854_v19 }
  0xd9   :  { %v2204_v44 = vpop.eup %2203  ;;  %1898 = vmatprep.subr.bf16.mxu1 %v1897_v61  ;;  %v1867_v25 = vpack.c.bf16 %v2202_v26, %v2200_v43  ;;  %2223 = vtanh.f32 %v623_v31  ;;  %1344 = vmatprep.mubr.f32.mxu1 %v2633_v33  ;;  %v624_v51 = vadd.f32 %v2873_v47, %v288_v29  ;;  %v319_v31 = vmul.f32 %v2993_v57, %v2888_v3 }
  0xda   :  { %v2206_v41 = vpop.eup %2205  ;;  %2225 = vtanh.f32 %v639_v63  ;;  %v640_v30 = vadd.f32 %v2871_v34, %v304_v16  ;;  %v335_v63 = vmul.f32 %v2993_v57, %v2886_v2 }
  0xdb   :  { %v2208_v42 = vpop.eup %2207  ;;  %1868 = vmatpush1.bf16.msra.mxu0 %v1867_v25  ;;  %v1899_v27 = vpack.c.bf16 %v2206_v41, %v2204_v44  ;;  %2227 = vtanh.f32 %v625_v5  ;;  %v655_v61 = vadd.f32 %v2901_v18, %v319_v31  ;;  %v321_v5 = vmul.f32 %v3033_v24, %v2888_v3 }
  0xdc   :  { %v2210_v59 = vpop.eup %2209  ;;  %2229 = vtanh.f32 %v641_v12  ;;  %v671_v26 = vadd.f32 %v2899_v17, %v335_v63  ;;  %v337_v12 = vmul.f32 %v3033_v24, %v2886_v2 }
  0xdd   :  { %v2212_v56 = vpop.eup %2211  ;;  %1900 = vmatpush1.bf16.msra.mxu1 %v1899_v27  ;;  %v1869_v43 = vpack.c.bf16 %v2210_v59, %v2208_v42  ;;  %2231 = vtanh.f32 %v622_v37  ;;  %v657_v25 = vadd.f32 %v2901_v18, %v321_v5  ;;  %v318_v37 = vmul.f32 %v3039_v28, %v2888_v3 }
  0xde   :  { %v2214_v40 = vpop.eup %2213  ;;  %2233 = vtanh.f32 %v638_v62  ;;  %v673_v41 = vadd.f32 %v2899_v17, %v337_v12  ;;  %v334_v62 = vmul.f32 %v3039_v28, %v2886_v2 }
  0xdf   :  { %v2216_v13 = vpop.eup %2215  ;;  %1870 = vmatprep.subr.bf16.mxu0 %v1869_v43  ;;  %v1901_v44 = vpack.c.bf16 %v2214_v40, %v2212_v56  ;;  %2235 = vtanh.f32 %v624_v51  ;;  %v654_v27 = vadd.f32 %v2901_v18, %v318_v37  ;;  %v320_v51 = vmul.f32 %v3047_v58, %v2888_v3 }
  0xe0   :  { %v2218_v29 = vpop.eup %2217  ;;  %2237 = vtanh.f32 %v640_v30  ;;  %v670_v59 = vadd.f32 %v2899_v17, %v334_v62  ;;  %v336_v30 = vmul.f32 %v3047_v58, %v2886_v2 }
  0xe1   :  { %v2220_v16 = vpop.eup %2219  ;;  %1902 = vmatprep.subr.bf16.mxu1 %v1901_v44  ;;  %v1871_v42 = vpack.c.bf16 %v2218_v29, %v2216_v13  ;;  %2239 = vtanh.f32 %v655_v61  ;;  %v656_v43 = vadd.f32 %v2901_v18, %v320_v51  ;;  %v351_v61 = vmul.f32 %v2993_v57, %v2920_v53 }
  0xe2   :  { %v2222_v31 = vpop.eup %2221  ;;  %2241 = vtanh.f32 %v671_v26  ;;  %v672_v40 = vadd.f32 %v2899_v17, %v336_v30  ;;  %v367_v26 = vmul.f32 %v2993_v57, %v2918_v52 }
  0xe3   :  { %v2224_v63 = vpop.eup %2223  ;;  %1872 = vmatpush1.bf16.msra.mxu0 %v1871_v42  ;;  %v1903_v56 = vpack.c.bf16 %v2222_v31, %v2220_v16  ;;  %2243 = vtanh.f32 %v657_v25  ;;  %v687_v44 = vadd.f32 %v2933_v11, %v351_v61  ;;  %v353_v25 = vmul.f32 %v3033_v24, %v2920_v53 }
  0xe4   :  { %v2226_v5 = vpop.eup %2225  ;;  %2245 = vtanh.f32 %v673_v41  ;;  %v703_v29 = vadd.f32 %v2931_v10, %v367_v26  ;;  %v369_v41 = vmul.f32 %v3033_v24, %v2918_v52 }
  0xe5   :  { %v2228_v12 = vpop.eup %2227  ;;  %1904 = vmatpush1.bf16.msra.mxu1 %v1903_v56  ;;  %v1873_v13 = vpack.c.bf16 %v2226_v5, %v2224_v63  ;;  %2247 = vtanh.f32 %v654_v27  ;;  %v689_v42 = vadd.f32 %v2933_v11, %v353_v25  ;;  %v350_v27 = vmul.f32 %v3039_v28, %v2920_v53 }
  0xe6   :  { %v2230_v37 = vpop.eup %2229  ;;  %2249 = vtanh.f32 %v670_v59  ;;  %v705_v31 = vadd.f32 %v2931_v10, %v369_v41  ;;  %v366_v59 = vmul.f32 %v3039_v28, %v2918_v52 }
  0xe7   :  { %v2232_v62 = vpop.eup %2231  ;;  %1874 = vmatprep.subr.bf16.mxu0 %v1873_v13  ;;  %v1905_v16 = vpack.c.bf16 %v2230_v37, %v2228_v12  ;;  %2251 = vtanh.f32 %v656_v43  ;;  %v686_v56 = vadd.f32 %v2933_v11, %v350_v27  ;;  %v352_v43 = vmul.f32 %v3047_v58, %v2920_v53 }
  0xe8   :  { %v2234_v51 = vpop.eup %2233  ;;  %2253 = vtanh.f32 %v672_v40  ;;  %v702_v5 = vadd.f32 %v2931_v10, %v366_v59  ;;  %v368_v40 = vmul.f32 %v3047_v58, %v2918_v52 }
  0xe9   :  { %v2236_v30 = vpop.eup %2235  ;;  %1906 = vmatprep.subr.bf16.mxu1 %v1905_v16  ;;  %v1875_v63 = vpack.c.bf16 %v2234_v51, %v2232_v62  ;;  %2255 = vtanh.f32 %v687_v44  ;;  %v688_v13 = vadd.f32 %v2933_v11, %v352_v43  ;;  %v383_v44 = vmul.f32 %v2993_v57, %v2952_v48 }
  0xea   :  { %v2238_v61 = vpop.eup %2237  ;;  %2257 = vtanh.f32 %v703_v29  ;;  %v704_v37 = vadd.f32 %v2931_v10, %v368_v40  ;;  %v399_v29 = vmul.f32 %v2993_v57, %v2950_v32 }
  0xeb   :  { %v2240_v26 = vpop.eup %2239  ;;  %1876 = vmatpush1.bf16.msra.mxu0 %v1875_v63  ;;  %v1907_v12 = vpack.c.bf16 %v2238_v61, %v2236_v30  ;;  %2259 = vtanh.f32 %v689_v42  ;;  %v719_v16 = vadd.f32 %v2966_v9, %v383_v44  ;;  %v385_v42 = vmul.f32 %v3033_v24, %v2952_v48 }
  0xec   :  { %v2242_v25 = vpop.eup %2241  ;;  %2261 = vtanh.f32 %v705_v31  ;;  %v735_v51 = vadd.f32 %v2964_v8, %v399_v29  ;;  %v401_v31 = vmul.f32 %v3033_v24, %v2950_v32 }
  0xed   :  { %v2244_v41 = vpop.eup %2243  ;;  %1908 = vmatpush1.bf16.msra.mxu1 %v1907_v12  ;;  %v1877_v62 = vpack.c.bf16 %v2242_v25, %v2240_v26  ;;  %2263 = vtanh.f32 %v686_v56  ;;  %v721_v63 = vadd.f32 %v2966_v9, %v385_v42  ;;  %v382_v56 = vmul.f32 %v3039_v28, %v2952_v48 }
  0xee   :  { %v2246_v27 = vpop.eup %2245  ;;  %2265 = vtanh.f32 %v702_v5  ;;  %v737_v61 = vadd.f32 %v2964_v8, %v401_v31  ;;  %v398_v5 = vmul.f32 %v3039_v28, %v2950_v32 }
  0xef   :  { %v2248_v59 = vpop.eup %2247  ;;  %1878 = vmatprep.subr.bf16.mxu0 %v1877_v62  ;;  %v1909_v30 = vpack.c.bf16 %v2246_v27, %v2244_v41  ;;  %2267 = vtanh.f32 %v688_v13  ;;  %v718_v12 = vadd.f32 %v2966_v9, %v382_v56  ;;  %v384_v13 = vmul.f32 %v3047_v58, %v2952_v48 }
  0xf0   :  { %v2250_v43 = vpop.eup %2249  ;;  %2269 = vtanh.f32 %v704_v37  ;;  %v734_v25 = vadd.f32 %v2964_v8, %v398_v5  ;;  %v400_v37 = vmul.f32 %v3047_v58, %v2950_v32  ;;  %v417_v56 = vmul.f32 %v3033_v24, %v2985_v50 }
  0xf1   :  { %v2252_v40 = vpop.eup %2251  ;;  %1910 = vmatprep.subr.bf16.mxu1 %v1909_v30  ;;  %v1879_v26 = vpack.c.bf16 %v2250_v43, %v2248_v59  ;;  %2271 = vtanh.f32 %v719_v16  ;;  %v720_v62 = vadd.f32 %v2966_v9, %v384_v13  ;;  %v415_v16 = vmul.f32 %v2993_v57, %v2985_v50  ;;  %v3235_v59 = vld [vmem:[%s3754_s0 + $0x8] sm:$0xff] }
  0xf2   :  { %v2254_v44 = vpop.eup %2253  ;;  %2273 = vtanh.f32 %v735_v51  ;;  %v736_v27 = vadd.f32 %v2964_v8, %v400_v37  ;;  %v431_v51 = vmul.f32 %v2993_v57, %v2983_v49  ;;  %v433_v5 = vmul.f32 %v3033_v24, %v2983_v49 }
  0xf3   :  { %v2256_v29 = vpop.eup %2255  ;;  %1880 = vmatpush1.bf16.msra.mxu0 %v1879_v26  ;;  %v1911_v41 = vpack.c.bf16 %v2254_v44, %v2252_v40  ;;  %2275 = vtanh.f32 %v721_v63  ;;  %v751_v63 = vadd.f32 %v3006_v23, %v415_v16  ;;  %v753_v13 = vadd.f32 %v3006_v23, %v417_v56 }
  0xf4   :  { %v2258_v42 = vpop.eup %2257  ;;  %2277 = vtanh.f32 %v737_v61  ;;  %v767_v61 = vadd.f32 %v3004_v22, %v431_v51  ;;  %v3249_v37 = vrot.slane %v3235_v59, %v140_v38  ;;  %v3260_v38 = vrot.slane %v3235_v59, %v148_v39 }
  0xf5   :  { %v2260_v31 = vpop.eup %2259  ;;  %1912 = vmatpush1.bf16.msra.mxu1 %v1911_v41  ;;  %v1881_v30 = vpack.c.bf16 %v2258_v42, %v2256_v29  ;;  %2279 = vtanh.f32 %v718_v12  ;;  %v414_v12 = vmul.f32 %v3039_v28, %v2985_v50  ;;  %v430_v29 = vmul.f32 %v3039_v28, %v2983_v49 }
  0xf6   :  { %v2262_v43 = vpop.eup %2261  ;;  %2281 = vtanh.f32 %v734_v25  ;;  %v769_v25 = vadd.f32 %v3004_v22, %v433_v5  ;;  %v416_v42 = vmul.f32 %v3047_v58, %v2985_v50 }
  0xf7   :  { %v2264_v40 = vpop.eup %2263  ;;  %1882 = vmatprep.subr.bf16.mxu0 %v1881_v30  ;;  %v1913_v26 = vpack.c.bf16 %v2262_v43, %v2260_v31  ;;  %2283 = vtanh.f32 %v720_v62  ;;  %v750_v16 = vadd.f32 %v3006_v23, %v414_v12  ;;  %v432_v31 = vmul.f32 %v3047_v58, %v2983_v49 }
  0xf8   :  { %v2266_v44 = vpop.eup %2265  ;;  %2285 = vtanh.f32 %v736_v27  ;;  %v766_v27 = vadd.f32 %v3004_v22, %v430_v29  ;;  %v752_v56 = vadd.f32 %v3006_v23, %v416_v42  ;;  %v447_v43 = vmul.f32 %v2993_v57, %v3025_v4 }
  0xf9   :  { %v2268_v41 = vpop.eup %2267  ;;  %1914 = vmatprep.subr.bf16.mxu1 %v1913_v26  ;;  %v1883_v62 = vpack.c.bf16 %v2266_v44, %v2264_v40  ;;  %2287 = vtanh.f32 %v751_v63  ;;  %v768_v39 = vadd.f32 %v3004_v22, %v432_v31  ;;  %v3274_v40 = vrot.slane %v3235_v59, %v144_v36 }
  0xfa   :  { %v2270_v51 = vpop.eup %2269  ;;  %2289 = vtanh.f32 %v767_v61  ;;  %v463_v61 = vmul.f32 %v2993_v57, %v3023_v15  ;;  %v783_v12 = vadd.f32 %v3055_v21, %v447_v43  ;;  %v449_v44 = vmul.f32 %v3033_v24, %v3025_v4 }
  0xfb   :  { %v2272_v30 = vpop.eup %2271  ;;  %1884 = vmatpush1.bf16.msra.mxu0 %v1883_v62  ;;  %v1915_v63 = vpack.c.bf16 %v2270_v51, %v2268_v41  ;;  %2291 = vtanh.f32 %v753_v13  ;;  %v465_v57 = vmul.f32 %v3033_v24, %v3023_v15  ;;  %v446_v36 = vmul.f32 %v3039_v28, %v3025_v4 }
  0xfc   :  { %v2274_v5 = vpop.eup %2273  ;;  %2293 = vtanh.f32 %v769_v25  ;;  %v799_v29 = vadd.f32 %v3053_v14, %v463_v61  ;;  %v3765_v42 = vsub.s32 3, %v2764_v35  ;;  %v462_v24 = vmul.f32 %v3039_v28, %v3023_v15 }
  0xfd   :  { %v2276_v26 = vpop.eup %2275  ;;  %1916 = vmatpush1.bf16.msra.mxu1 %v1915_v63  ;;  %v1885_v13 = vpack.c.bf16 %v2274_v5, %v2272_v30  ;;  %2295 = vtanh.f32 %v750_v16  ;;  %v785_v16 = vadd.f32 %v3055_v21, %v449_v44  ;;  %v801_v31 = vadd.f32 %v3053_v14, %v465_v57 }
  0xfe   :  { %v2278_v25 = vpop.eup %2277  ;;  %2297 = vtanh.f32 %v766_v27  ;;  %v3288_v51 = vrot.slane %v3235_v59, %v3765_v42  ;;  %v448_v30 = vmul.f32 %v3047_v58, %v3025_v4  ;;  %v782_v43 = vadd.f32 %v3055_v21, %v446_v36 }
  0xff   :  { %v2280_v41 = vpop.eup %2279  ;;  %1886 = vmatprep.subr.bf16.mxu0 %v1885_v13  ;;  %v1917_v62 = vpack.c.bf16 %v2278_v25, %v2276_v26  ;;  %2299 = vtanh.f32 %v752_v56  ;;  %v227_v5 = vmul.f32 %v3274_v40, %v2797_v46  ;;  %v464_v26 = vmul.f32 %v3047_v58, %v3023_v15 }
 0x100   :  { %v2282_v27 = vpop.eup %2281  ;;  %2301 = vtanh.f32 %v768_v39  ;;  %v798_v39 = vadd.f32 %v3053_v14, %v462_v24  ;;  %v243_v28 = vmul.f32 %v3274_v40, %v2812_v55  ;;  %v229_v25 = vmul.f32 %v3288_v51, %v2797_v46 }
 0x101   :  { %v2284_v63 = vpop.eup %2283  ;;  %1918 = vmatprep.subr.bf16.mxu1 %v1917_v62  ;;  %v1887_v56 = vpack.c.bf16 %v2282_v27, %v2280_v41  ;;  %2303 = vtanh.f32 %v783_v12  ;;  %v784_v12 = vadd.f32 %v3055_v21, %v448_v30  ;;  %v245_v36 = vmul.f32 %v3288_v51, %v2812_v55 }
 0x102   :  { %v2286_v61 = vpop.eup %2285  ;;  %2305 = vtanh.f32 %v799_v29  ;;  %v800_v29 = vadd.f32 %v3053_v14, %v464_v26  ;;  %v563_v62 = vadd.f32 %v2795_v45, %v227_v5  ;;  %v579_v27 = vadd.f32 %v2810_v54, %v243_v28 }
 0x103   :  { %v2288_v13 = vpop.eup %2287  ;;  %1888 = vmatpush1.bf16.msra.mxu0 %v1887_v56  ;;  %v1919_v44 = vpack.c.bf16 %v2286_v61, %v2284_v63  ;;  %2307 = vtanh.f32 %v785_v16  ;;  %v226_v16 = vmul.f32 %v3249_v37, %v2797_v46  ;;  %v565_v63 = vadd.f32 %v2795_v45, %v229_v25 }
 0x104   :  { %v2290_v57 = vpop.eup %2289  ;;  %2309 = vtanh.f32 %v801_v31  ;;  %v242_v31 = vmul.f32 %v3249_v37, %v2812_v55  ;;  %v228_v56 = vmul.f32 %v3260_v38, %v2797_v46  ;;  %v581_v5 = vadd.f32 %v2810_v54, %v245_v36 }
 0x105   :  { %v2292_v58 = vpop.eup %2291  ;;  %1920 = vmatpush1.bf16.msra.mxu1 %v1919_v44  ;;  %v1889_v41 = vpack.c.bf16 %v2290_v57, %v2288_v13  ;;  %2311 = vtanh.f32 %v782_v43  ;;  %v244_v61 = vmul.f32 %v3260_v38, %v2812_v55  ;;  %v562_v28 = vadd.f32 %v2795_v45, %v226_v16 }
 0x106   :  { %v2294_v42 = vpop.eup %2293  ;;  %2313 = vtanh.f32 %v798_v39  ;;  %v578_v44 = vadd.f32 %v2810_v54, %v242_v31  ;;  %v564_v57 = vadd.f32 %v2795_v45, %v228_v56 }
 0x107   :  { %v2296_v24 = vpop.eup %2295  ;;  %1890 = vmatprep.subr.bf16.mxu0 %v1889_v41  ;;  %v1921_v30 = vpack.c.bf16 %v2294_v42, %v2292_v58  ;;  %2315 = vtanh.f32 %v784_v12  ;;  %v580_v58 = vadd.f32 %v2810_v54, %v244_v61  ;;  %v275_v41 = vmul.f32 %v3274_v40, %v2826_v0 }
 0x108   :  { %v2298_v43 = vpop.eup %2297  ;;  %2317 = vtanh.f32 %v800_v29  ;;  %v259_v29 = vmul.f32 %v3274_v40, %v2828_v1 }
 0x109   :  { %v2300_v39 = vpop.eup %2299  ;;  %1922 = vmatprep.subr.bf16.mxu1 %v1921_v30  ;;  %v1891_v26 = vpack.c.bf16 %v2298_v43, %v2296_v24  ;;  %2319 = vtanh.f32 %v563_v62  ;;  %v611_v24 = vadd.f32 %v2837_v6, %v275_v41  ;;  %v277_v30 = vmul.f32 %v3288_v51, %v2826_v0 }
 0x10a   :  { %v2302_v13 = vpop.eup %2301  ;;  %2321 = vtanh.f32 %v579_v27  ;;  %v595_v42 = vadd.f32 %v2839_v7, %v259_v29  ;;  %v261_v27 = vmul.f32 %v3288_v51, %v2828_v1  ;;  %v276_v29 = vmul.f32 %v3260_v38, %v2826_v0 }
 0x10b   :  { %v2304_v12 = vpop.eup %2303  ;;  %1892 = vmatpush1.bf16.msra.mxu0 %v1891_v26  ;;  %v1923_v25 = vpack.c.bf16 %v2302_v13, %v2300_v39  ;;  %2323 = vtanh.f32 %v565_v63  ;;  %v613_v39 = vadd.f32 %v2837_v6, %v277_v30  ;;  %v274_v26 = vmul.f32 %v3249_v37, %v2826_v0 }
 0x10c   :  { %v2306_v36 = vpop.eup %2305  ;;  %2325 = vtanh.f32 %v581_v5  ;;  %v597_v43 = vadd.f32 %v2839_v7, %v261_v27  ;;  %v258_v5 = vmul.f32 %v3249_v37, %v2828_v1  ;;  %v307_v27 = vmul.f32 %v3274_v40, %v2854_v19 }
 0x10d   :  { %v2308_v62 = vpop.eup %2307  ;;  %1924 = vmatpush1.bf16.msra.mxu1 %v1923_v25  ;;  %v1893_v16 = vpack.c.bf16 %v2306_v36, %v2304_v12  ;;  %2327 = vtanh.f32 %v562_v28  ;;  %v260_v12 = vmul.f32 %v3260_v38, %v2828_v1 }
 0x10e   :  { %v2310_v31 = vpop.eup %2309  ;;  %2329 = vtanh.f32 %v578_v44  ;;  %v594_v44 = vadd.f32 %v2839_v7, %v258_v5  ;;  %v309_v5 = vmul.f32 %v3288_v51, %v2854_v19 }
 0x10f   :  { %v2312_v63 = vpop.eup %2311  ;;  %1894 = vmatprep.subr.bf16.mxu0 %v1893_v16  ;;  %v1925_v56 = vpack.c.bf16 %v2310_v31, %v2308_v62  ;;  %2331 = vtanh.f32 %v564_v57  ;;  %v610_v57 = vadd.f32 %v2837_v6, %v274_v26  ;;  %v596_v41 = vadd.f32 %v2839_v7, %v260_v12 }
 0x110   :  { %v2314_v61 = vpop.eup %2313  ;;  %2333 = vtanh.f32 %v580_v58  ;;  %v291_v62 = vmul.f32 %v3274_v40, %v2856_v20  ;;  %v306_v12 = vmul.f32 %v3249_v37, %v2854_v19 }
 0x111   :  { %v2316_v28 = vpop.eup %2315  ;;  %1926 = vmatprep.subr.bf16.mxu1 %v1925_v56  ;;  %v1895_v13 = vpack.c.bf16 %v2314_v61, %v2312_v63  ;;  %2335 = vtanh.f32 %v595_v42  ;;  %v612_v42 = vadd.f32 %v2837_v6, %v276_v29  ;;  %v293_v63 = vmul.f32 %v3288_v51, %v2856_v20 }
 0x112   :  { %v2318_v25 = vpop.eup %2317  ;;  %2337 = vtanh.f32 %v611_v24  ;;  %v627_v30 = vadd.f32 %v2873_v47, %v291_v62 }
 0x113   :  { %v2320_v36 = vpop.eup %2319  ;;  %1896 = vmatpush1.bf16.msra.mxu0 %v1895_v13  ;;  %v1927_v58 = vpack.c.bf16 %v2318_v25, %v2316_v28  ;;  %2339 = vtanh.f32 %v597_v43  ;;  %v643_v43 = vadd.f32 %v2871_v34, %v307_v27  ;;  %v629_v26 = vadd.f32 %v2873_v47, %v293_v63 }
 0x114   :  { %v2322_v16 = vpop.eup %2321  ;;  %2341 = vtanh.f32 %v613_v39  ;;  %v290_v28 = vmul.f32 %v3249_v37, %v2856_v20  ;;  %v323_v27 = vmul.f32 %v3274_v40, %v2888_v3 }
 0x115   :  { %v2324_v31 = vpop.eup %2323  ;;  %1928 = vmatpush1.bf16.msra.mxu1 %v1927_v58  ;;  %v1929_v24 = vpack.c.bf16 %v2322_v16, %v2320_v36  ;;  %2343 = vtanh.f32 %v594_v44  ;;  %v645_v44 = vadd.f32 %v2871_v34, %v309_v5  ;;  %v292_v36 = vmul.f32 %v3260_v38, %v2856_v20 }
 0x116   :  { %v2326_v56 = vpop.eup %2325  ;;  %1274 = vmatmul.mubr.f32.vlgmr.msra.gmra.mrb[2].mxu0 %v3124_v60  ;;  %2345 = vtanh.f32 %v610_v57  ;;  %v626_v29 = vadd.f32 %v2873_v47, %v290_v28  ;;  %v325_v5 = vmul.f32 %v3288_v51, %v2888_v3 }
 0x117   :  { %v2328_v61 = vpop.eup %2327  ;;  %1930 = vmatprep.subr.bf16.mxu0 %v1929_v24  ;;  %v1961_v39 = vpack.c.bf16 %v2326_v56, %v2324_v31  ;;  %2347 = vtanh.f32 %v596_v41  ;;  %1415 = vmatprep.mubr.f32.mxu0 %v2633_v33  ;;  %v308_v41 = vmul.f32 %v3260_v38, %v2854_v19 }
 0x118   :  { %v2330_v13 = vpop.eup %2329  ;;  %1345 = vmatmul.mubr.f32.vlgmr.msra.gmra.mrb[2].mxu1 %v3124_v60  ;;  %2349 = vtanh.f32 %v612_v42  ;;  %v642_v60 = vadd.f32 %v2871_v34, %v306_v12  ;;  %v628_v42 = vadd.f32 %v2873_v47, %v292_v36  ;;  %v322_v12 = vmul.f32 %v3249_v37, %v2888_v3 }
 0x119   :  { %v2332_v25 = vpop.eup %2331  ;;  %1962 = vmatprep.subr.bf16.mxu1 %v1961_v39  ;;  %v1931_v57 = vpack.c.bf16 %v2330_v13, %v2328_v61  ;;  %2351 = vtanh.f32 %v627_v30  ;;  %1486 = vmatprep.mubr.f32.mxu1 %v2633_v33  ;;  %v644_v24 = vadd.f32 %v2871_v34, %v308_v41  ;;  %v339_v30 = vmul.f32 %v3274_v40, %v2886_v2 }
 0x11a   :  { %v2334_v58 = vpop.eup %2333  ;;  %2353 = vtanh.f32 %v643_v43  ;;  %v659_v43 = vadd.f32 %v2901_v18, %v323_v27  ;;  %v324_v41 = vmul.f32 %v3260_v38, %v2888_v3 }
 0x11b   :  { %v2336_v62 = vpop.eup %2335  ;;  %1932 = vmatpush1.bf16.msra.mxu0 %v1931_v57  ;;  %v1963_v16 = vpack.c.bf16 %v2334_v58, %v2332_v25  ;;  %2355 = vtanh.f32 %v629_v26  ;;  %v675_v39 = vadd.f32 %v2899_v17, %v339_v30  ;;  %v341_v26 = vmul.f32 %v3288_v51, %v2886_v2 }
 0x11c   :  { %v2338_v31 = vpop.eup %2337  ;;  %2357 = vtanh.f32 %v645_v44  ;;  %v661_v44 = vadd.f32 %v2901_v18, %v325_v5  ;;  %v355_v30 = vmul.f32 %v3274_v40, %v2920_v53 }
 0x11d   :  { %v2340_v63 = vpop.eup %2339  ;;  %1964 = vmatpush1.bf16.msra.mxu1 %v1963_v16  ;;  %v1933_v56 = vpack.c.bf16 %v2338_v31, %v2336_v62  ;;  %2359 = vtanh.f32 %v626_v29  ;;  %v677_v57 = vadd.f32 %v2899_v17, %v341_v26  ;;  %v338_v29 = vmul.f32 %v3249_v37, %v2886_v2 }
 0x11e   :  { %v2342_v61 = vpop.eup %2341  ;;  %2361 = vtanh.f32 %v642_v60  ;;  %v658_v60 = vadd.f32 %v2901_v18, %v322_v12  ;;  %v357_v26 = vmul.f32 %v3288_v51, %v2920_v53 }
 0x11f   :  { %v2344_v28 = vpop.eup %2343  ;;  %1934 = vmatprep.subr.bf16.mxu0 %v1933_v56  ;;  %v1965_v13 = vpack.c.bf16 %v2342_v61, %v2340_v63  ;;  %2363 = vtanh.f32 %v628_v42  ;;  %v674_v16 = vadd.f32 %v2899_v17, %v338_v29  ;;  %v340_v42 = vmul.f32 %v3260_v38, %v2886_v2 }
 0x120   :  { %v2346_v25 = vpop.eup %2345  ;;  %2365 = vtanh.f32 %v644_v24  ;;  %v660_v24 = vadd.f32 %v2901_v18, %v324_v41  ;;  %v354_v29 = vmul.f32 %v3249_v37, %v2920_v53 }
 0x121   :  { %v2348_v36 = vpop.eup %2347  ;;  %1966 = vmatprep.subr.bf16.mxu1 %v1965_v13  ;;  %v1935_v58 = vpack.c.bf16 %v2346_v25, %v2344_v28  ;;  %2367 = vtanh.f32 %v659_v43  ;;  %v676_v56 = vadd.f32 %v2899_v17, %v340_v42  ;;  %v371_v43 = vmul.f32 %v3274_v40, %v2918_v52 }
 0x122   :  { %v2350_v62 = vpop.eup %2349  ;;  %2369 = vtanh.f32 %v675_v39  ;;  %v691_v39 = vadd.f32 %v2933_v11, %v355_v30  ;;  %v356_v42 = vmul.f32 %v3260_v38, %v2920_v53 }
 0x123   :  { %v2352_v27 = vpop.eup %2351  ;;  %1936 = vmatpush1.bf16.msra.mxu0 %v1935_v58  ;;  %v1967_v31 = vpack.c.bf16 %v2350_v62, %v2348_v36  ;;  %2371 = vtanh.f32 %v661_v44  ;;  %v707_v13 = vadd.f32 %v2931_v10, %v371_v43  ;;  %v373_v44 = vmul.f32 %v3288_v51, %v2918_v52 }
 0x124   :  { %v2354_v63 = vpop.eup %2353  ;;  %2373 = vtanh.f32 %v677_v57  ;;  %v693_v57 = vadd.f32 %v2933_v11, %v357_v26  ;;  %v387_v43 = vmul.f32 %v3274_v40, %v2952_v48 }
 0x125   :  { %v2356_v5 = vpop.eup %2355  ;;  %1968 = vmatpush1.bf16.msra.mxu1 %v1967_v31  ;;  %v1937_v61 = vpack.c.bf16 %v2354_v63, %v2352_v27  ;;  %2375 = vtanh.f32 %v658_v60  ;;  %v709_v58 = vadd.f32 %v2931_v10, %v373_v44  ;;  %v370_v60 = vmul.f32 %v3249_v37, %v2918_v52 }
 0x126   :  { %v2358_v28 = vpop.eup %2357  ;;  %2377 = vtanh.f32 %v674_v16  ;;  %v690_v16 = vadd.f32 %v2933_v11, %v354_v29  ;;  %v389_v44 = vmul.f32 %v3288_v51, %v2952_v48 }
 0x127   :  { %v2360_v12 = vpop.eup %2359  ;;  %1938 = vmatprep.subr.bf16.mxu0 %v1937_v61  ;;  %v1969_v25 = vpack.c.bf16 %v2358_v28, %v2356_v5  ;;  %2379 = vtanh.f32 %v660_v24  ;;  %v706_v31 = vadd.f32 %v2931_v10, %v370_v60  ;;  %v372_v24 = vmul.f32 %v3260_v38, %v2918_v52 }
 0x128   :  { %v2362_v36 = vpop.eup %2361  ;;  %2381 = vtanh.f32 %v676_v56  ;;  %v692_v56 = vadd.f32 %v2933_v11, %v356_v42  ;;  %v386_v60 = vmul.f32 %v3249_v37, %v2952_v48 }
 0x129   :  { %v2364_v41 = vpop.eup %2363  ;;  %1970 = vmatprep.subr.bf16.mxu1 %v1969_v25  ;;  %v1939_v62 = vpack.c.bf16 %v2362_v36, %v2360_v12  ;;  %2383 = vtanh.f32 %v691_v39  ;;  %v708_v61 = vadd.f32 %v2931_v10, %v372_v24  ;;  %v403_v39 = vmul.f32 %v3274_v40, %v2950_v32 }
 0x12a   :  { %v2366_v27 = vpop.eup %2365  ;;  %2385 = vtanh.f32 %v707_v13  ;;  %v723_v13 = vadd.f32 %v2966_v9, %v387_v43  ;;  %v388_v24 = vmul.f32 %v3260_v38, %v2952_v48 }
 0x12b   :  { %v2368_v30 = vpop.eup %2367  ;;  %1940 = vmatpush1.bf16.msra.mxu0 %v1939_v62  ;;  %v1971_v63 = vpack.c.bf16 %v2366_v27, %v2364_v41  ;;  %2387 = vtanh.f32 %v693_v57  ;;  %v739_v25 = vadd.f32 %v2964_v8, %v403_v39  ;;  %v405_v57 = vmul.f32 %v3288_v51, %v2950_v32 }
 0x12c   :  { %v2370_v5 = vpop.eup %2369  ;;  %2389 = vtanh.f32 %v709_v58  ;;  %v725_v58 = vadd.f32 %v2966_v9, %v389_v44  ;;  %v419_v39 = vmul.f32 %v3274_v40, %v2985_v50 }
 0x12d   :  { %v2372_v26 = vpop.eup %2371  ;;  %1972 = vmatpush1.bf16.msra.mxu1 %v1971_v63  ;;  %v1941_v28 = vpack.c.bf16 %v2370_v5, %v2368_v30  ;;  %2391 = vtanh.f32 %v690_v16  ;;  %v741_v62 = vadd.f32 %v2964_v8, %v405_v57  ;;  %v402_v16 = vmul.f32 %v3249_v37, %v2950_v32 }
 0x12e   :  { %v2374_v12 = vpop.eup %2373  ;;  %2393 = vtanh.f32 %v706_v31  ;;  %v722_v31 = vadd.f32 %v2966_v9, %v386_v60  ;;  %v421_v57 = vmul.f32 %v3288_v51, %v2985_v50 }
 0x12f   :  { %v2376_v29 = vpop.eup %2375  ;;  %1942 = vmatprep.subr.bf16.mxu0 %v1941_v28  ;;  %v1973_v36 = vpack.c.bf16 %v2374_v12, %v2372_v26  ;;  %2395 = vtanh.f32 %v692_v56  ;;  %v738_v63 = vadd.f32 %v2964_v8, %v402_v16  ;;  %v404_v56 = vmul.f32 %v3260_v38, %v2950_v32 }
 0x130   :  { %v2378_v41 = vpop.eup %2377  ;;  %2397 = vtanh.f32 %v708_v61  ;;  %v724_v61 = vadd.f32 %v2966_v9, %v388_v24  ;;  %v418_v16 = vmul.f32 %v3249_v37, %v2985_v50  ;;  %v420_v24 = vmul.f32 %v3260_v38, %v2985_v50 }
 0x131   :  { %v2380_v42 = vpop.eup %2379  ;;  %1974 = vmatprep.subr.bf16.mxu1 %v1973_v36  ;;  %v1943_v27 = vpack.c.bf16 %v2378_v41, %v2376_v29  ;;  %2399 = vtanh.f32 %v723_v13  ;;  %v740_v28 = vadd.f32 %v2964_v8, %v404_v56  ;;  %v435_v13 = vmul.f32 %v3274_v40, %v2983_v49 }
 0x132   :  { %v2382_v30 = vpop.eup %2381  ;;  %2401 = vtanh.f32 %v739_v25  ;;  %v755_v25 = vadd.f32 %v3006_v23, %v419_v39  ;;  %v754_v56 = vadd.f32 %v3006_v23, %v418_v16  ;;  %v756_v39 = vadd.f32 %v3006_v23, %v420_v24 }
 0x133   :  { %v2384_v43 = vpop.eup %2383  ;;  %1944 = vmatpush1.bf16.msra.mxu0 %v1943_v27  ;;  %v1975_v5 = vpack.c.bf16 %v2382_v30, %v2380_v42  ;;  %2403 = vtanh.f32 %v725_v58  ;;  %v771_v36 = vadd.f32 %v3004_v22, %v435_v13  ;;  %v437_v58 = vmul.f32 %v3288_v51, %v2983_v49 }
 0x134   :  { %v2386_v26 = vpop.eup %2385  ;;  %2405 = vtanh.f32 %v741_v62  ;;  %v757_v62 = vadd.f32 %v3006_v23, %v421_v57 }
 0x135   :  { %v2388_v44 = vpop.eup %2387  ;;  %1976 = vmatpush1.bf16.msra.mxu1 %v1975_v5  ;;  %v1945_v12 = vpack.c.bf16 %v2386_v26, %v2384_v43  ;;  %2407 = vtanh.f32 %v722_v31  ;;  %v773_v27 = vadd.f32 %v3004_v22, %v437_v58  ;;  %v434_v31 = vmul.f32 %v3249_v37, %v2983_v49 }
 0x136   :  { %v2390_v29 = vpop.eup %2389  ;;  %2409 = vtanh.f32 %v738_v63  ;;  %v436_v43 = vmul.f32 %v3260_v38, %v2983_v49  ;;  %v451_v26 = vmul.f32 %v3274_v40, %v3025_v4 }
 0x137   :  { %v2392_v60 = vpop.eup %2391  ;;  %1946 = vmatprep.subr.bf16.mxu0 %v1945_v12  ;;  %v1977_v41 = vpack.c.bf16 %v2390_v29, %v2388_v44  ;;  %2411 = vtanh.f32 %v724_v61  ;;  %v770_v61 = vadd.f32 %v3004_v22, %v434_v31  ;;  %v467_v12 = vmul.f32 %v3274_v40, %v3023_v15 }
 0x138   :  { %v2394_v42 = vpop.eup %2393  ;;  %2413 = vtanh.f32 %v740_v28  ;;  %v772_v44 = vadd.f32 %v3004_v22, %v436_v43  ;;  %v787_v57 = vadd.f32 %v3055_v21, %v451_v26  ;;  %v453_v29 = vmul.f32 %v3288_v51, %v3025_v4 }
 0x139   :  { %v2396_v30 = vpop.eup %2395  ;;  %1978 = vmatprep.subr.bf16.mxu1 %v1977_v41  ;;  %v1947_v63 = vpack.c.bf16 %v2394_v42, %v2392_v60  ;;  %2415 = vtanh.f32 %v755_v25  ;;  %v450_v41 = vmul.f32 %v3249_v37, %v3025_v4  ;;  %v803_v42 = vadd.f32 %v3053_v14, %v467_v12 }
 0x13a   :  { %v2398_v5 = vpop.eup %2397  ;;  %2417 = vtanh.f32 %v771_v36  ;;  %v469_v36 = vmul.f32 %v3288_v51, %v3023_v15  ;;  %v466_v51 = vmul.f32 %v3249_v37, %v3023_v15  ;;  %v452_v37 = vmul.f32 %v3260_v38, %v3025_v4 }
 0x13b   :  { %v2400_v28 = vpop.eup %2399  ;;  %1948 = vmatpush1.bf16.msra.mxu0 %v1947_v63  ;;  %v1979_v13 = vpack.c.bf16 %v2398_v5, %v2396_v30  ;;  %2419 = vtanh.f32 %v757_v62  ;;  %v3766_v62 = vsub.s32 5, %v2764_v35  ;;  %v3767_v63 = vsub.s32 7, %v2764_v35 }
 0x13c   :  { %v2402_v25 = vpop.eup %2401  ;;  %2421 = vtanh.f32 %v773_v27  ;;  %v789_v27 = vadd.f32 %v3055_v21, %v453_v29  ;;  %v805_v30 = vadd.f32 %v3053_v14, %v469_v36  ;;  %v786_v5 = vadd.f32 %v3055_v21, %v450_v41 }
 0x13d   :  { %v2404_v58 = vpop.eup %2403  ;;  %1980 = vmatpush1.bf16.msra.mxu1 %v1979_v13  ;;  %v1949_v60 = vpack.c.bf16 %v2402_v25, %v2400_v28  ;;  %2423 = vtanh.f32 %v754_v56  ;;  %v3487_v40 = vrot.slane %v3235_v59, %v3766_v62  ;;  %v3497_v56 = vrot.slane %v3235_v59, %v3767_v63 }
 0x13e   :  { %v2406_v16 = vpop.eup %2405  ;;  %2425 = vtanh.f32 %v770_v61  ;;  %v802_v61 = vadd.f32 %v3053_v14, %v466_v51  ;;  %v3768_v13 = vsub.s32 4, %v2764_v35  ;;  %v468_v25 = vmul.f32 %v3260_v38, %v3023_v15 }
 0x13f   :  { %v2408_v31 = vpop.eup %2407  ;;  %1950 = vmatprep.subr.bf16.mxu0 %v1949_v60  ;;  %v1981_v24 = vpack.c.bf16 %v2406_v16, %v2404_v58  ;;  %2427 = vtanh.f32 %v756_v39  ;;  %v231_v39 = vmul.f32 %v3487_v40, %v2797_v46  ;;  %v788_v29 = vadd.f32 %v3055_v21, %v452_v37 }
 0x140   :  { %v2410_v43 = vpop.eup %2409  ;;  %2429 = vtanh.f32 %v772_v44  ;;  %v3508_v12 = vrot.slane %v3235_v59, %v3768_v13  ;;  %v247_v36 = vmul.f32 %v3487_v40, %v2812_v55  ;;  %v233_v60 = vmul.f32 %v3497_v56, %v2797_v46 }
 0x141   :  { %v2412_v26 = vpop.eup %2411  ;;  %1982 = vmatprep.subr.bf16.mxu1 %v1981_v24  ;;  %v1951_v28 = vpack.c.bf16 %v2410_v43, %v2408_v31  ;;  %2431 = vtanh.f32 %v787_v57  ;;  %v3769_v41 = vsub.s32 6, %v2764_v35  ;;  %v804_v38 = vadd.f32 %v3053_v14, %v468_v25 }
 0x142   :  { %v2414_v44 = vpop.eup %2413  ;;  %2433 = vtanh.f32 %v803_v42  ;;  %v249_v42 = vmul.f32 %v3497_v56, %v2812_v55  ;;  %v230_v24 = vmul.f32 %v3508_v12, %v2797_v46 }
 0x143   :  { %v2416_v58 = vpop.eup %2415  ;;  %1952 = vmatpush1.bf16.msra.mxu0 %v1951_v28  ;;  %v1983_v57 = vpack.c.bf16 %v2414_v44, %v2412_v26  ;;  %2435 = vtanh.f32 %v789_v27  ;;  %v3520_v62 = vrot.slane %v3235_v59, %v3769_v41  ;;  %v567_v27 = vadd.f32 %v2795_v45, %v231_v39 }
 0x144   :  { %v2418_v16 = vpop.eup %2417  ;;  %2437 = vtanh.f32 %v805_v30  ;;  %v583_v59 = vadd.f32 %v2810_v54, %v247_v36  ;;  %v246_v30 = vmul.f32 %v3508_v12, %v2812_v55  ;;  %v569_v26 = vadd.f32 %v2795_v45, %v233_v60 }
 0x145   :  { %v2420_v51 = vpop.eup %2419  ;;  %1984 = vmatpush1.bf16.msra.mxu1 %v1983_v57  ;;  %v1953_v31 = vpack.c.bf16 %v2418_v16, %v2416_v58  ;;  %2439 = vtanh.f32 %v786_v5  ;;  %v232_v5 = vmul.f32 %v3520_v62, %v2797_v46  ;;  %v585_v39 = vadd.f32 %v2810_v54, %v249_v42 }
 0x146   :  { %v2422_v63 = vpop.eup %2421  ;;  %2441 = vtanh.f32 %v802_v61  ;;  %v248_v61 = vmul.f32 %v3520_v62, %v2812_v55  ;;  %v566_v25 = vadd.f32 %v2795_v45, %v230_v24  ;;  %v263_v60 = vmul.f32 %v3487_v40, %v2828_v1 }
 0x147   :  { %v2424_v43 = vpop.eup %2423  ;;  %1954 = vmatprep.subr.bf16.mxu0 %v1953_v31  ;;  %v1985_v37 = vpack.c.bf16 %v2422_v63, %v2420_v51  ;;  %2443 = vtanh.f32 %v788_v29  ;;  %v582_v29 = vadd.f32 %v2810_v54, %v246_v30  ;;  %v568_v57 = vadd.f32 %v2795_v45, %v232_v5 }
 0x148   :  { %v2426_v28 = vpop.eup %2425  ;;  %2445 = vtanh.f32 %v804_v38  ;;  %v584_v41 = vadd.f32 %v2810_v54, %v248_v61  ;;  %v279_v16 = vmul.f32 %v3487_v40, %v2826_v0  ;;  %v599_v51 = vadd.f32 %v2839_v7, %v263_v60 }
 0x149   :  { %v2428_v13 = vpop.eup %2427  ;;  %1986 = vmatprep.subr.bf16.mxu1 %v1985_v37  ;;  %v1955_v44 = vpack.c.bf16 %v2426_v28, %v2424_v43  ;;  %2447 = vtanh.f32 %v567_v27  ;;  %v265_v31 = vmul.f32 %v3497_v56, %v2828_v1  ;;  %v281_v24 = vmul.f32 %v3497_v56, %v2826_v0 }
 0x14a   :  { %v2430_v36 = vpop.eup %2429  ;;  %2449 = vtanh.f32 %v583_v59  ;;  %v615_v27 = vadd.f32 %v2837_v6, %v279_v16  ;;  %v262_v30 = vmul.f32 %v3508_v12, %v2828_v1  ;;  %v264_v61 = vmul.f32 %v3520_v62, %v2828_v1 }
 0x14b   :  { %v2432_v58 = vpop.eup %2431  ;;  %1956 = vmatpush1.bf16.msra.mxu0 %v1955_v44  ;;  %v1987_v46 = vpack.c.bf16 %v2430_v36, %v2428_v13  ;;  %2451 = vtanh.f32 %v569_v26  ;;  %v601_v59 = vadd.f32 %v2839_v7, %v265_v31  ;;  %v617_v37 = vadd.f32 %v2837_v6, %v281_v24 }
 0x14c   :  { %v2434_v55 = vpop.eup %2433  ;;  %2453 = vtanh.f32 %v585_v39  ;;  %v278_v26 = vmul.f32 %v3508_v12, %v2826_v0  ;;  %v598_v39 = vadd.f32 %v2839_v7, %v262_v30  ;;  %v311_v60 = vmul.f32 %v3487_v40, %v2854_v19 }
 0x14d   :  { %v2436_v38 = vpop.eup %2435  ;;  %1988 = vmatpush1.bf16.msra.mxu1 %v1987_v46  ;;  %v1957_v42 = vpack.c.bf16 %v2434_v55, %v2432_v58  ;;  %2455 = vtanh.f32 %v566_v25  ;;  %v280_v25 = vmul.f32 %v3520_v62, %v2826_v0  ;;  %v600_v58 = vadd.f32 %v2839_v7, %v264_v61 }
 0x14e   :  { %v2438_v45 = vpop.eup %2437  ;;  %2457 = vtanh.f32 %v582_v29  ;;  %v614_v44 = vadd.f32 %v2837_v6, %v278_v26  ;;  %v295_v46 = vmul.f32 %v3487_v40, %v2856_v20  ;;  %v297_v16 = vmul.f32 %v3497_v56, %v2856_v20 }
 0x14f   :  { %v2440_v54 = vpop.eup %2439  ;;  %1958 = vmatprep.subr.bf16.mxu0 %v1957_v42  ;;  %v1989_v63 = vpack.c.bf16 %v2438_v45, %v2436_v38  ;;  %2459 = vtanh.f32 %v568_v57  ;;  %v616_v1 = vadd.f32 %v2837_v6, %v280_v25  ;;  %v3575_v38 = vld [vmem:[%s3757_s3] sm:$0xff]  ;;  %v647_v6 = vadd.f32 %v2871_v34, %v311_v60 }
 0x150   :  { %v2442_v43 = vpop.eup %2441  ;;  %2461 = vtanh.f32 %v584_v41  ;;  %v631_v0 = vadd.f32 %v2873_v47, %v295_v46  ;;  %v313_v42 = vmul.f32 %v3497_v56, %v2854_v19  ;;  %v633_v45 = vadd.f32 %v2873_v47, %v297_v16 }
 0x151   :  { %v2444_v5 = vpop.eup %2443  ;;  %1990 = vmatprep.subr.bf16.mxu1 %v1989_v63  ;;  %v1959_v28 = vpack.c.bf16 %v2442_v43, %v2440_v54  ;;  %2463 = vtanh.f32 %v599_v51  ;;  %v310_v63 = vmul.f32 %v3508_v12, %v2854_v19  ;;  %v342_v16 = vmul.f32 %v3508_v12, %v2886_v2 }
 0x152   :  { %v2446_v13 = vpop.eup %2445  ;;  %2465 = vtanh.f32 %v615_v27  ;;  %v294_v27 = vmul.f32 %v3508_v12, %v2856_v20  ;;  %v649_v54 = vadd.f32 %v2871_v34, %v313_v42 }
 0x153   :  { %v2448_v36 = vpop.eup %2447  ;;  %1960 = vmatpush1.bf16.msra.mxu0 %v1959_v28  ;;  %v1991_v29 = vpack.c.bf16 %v2446_v13, %v2444_v5  ;;  %2467 = vtanh.f32 %v601_v59  ;;  %v646_v5 = vadd.f32 %v2871_v34, %v310_v63  ;;  %v312_v28 = vmul.f32 %v3520_v62, %v2854_v19 }
 0x154   :  { %v2450_v57 = vpop.eup %2449  ;;  %2469 = vtanh.f32 %v617_v37  ;;  %v630_v43 = vadd.f32 %v2873_v47, %v294_v27  ;;  %v296_v37 = vmul.f32 %v3520_v62, %v2856_v20  ;;  %v343_v20 = vmul.f32 %v3487_v40, %v2886_v2 }
 0x155   :  { %v2452_v55 = vpop.eup %2451  ;;  %1992 = vmatpush1.bf16.msra.mxu1 %v1991_v29  ;;  %v1993_v41 = vpack.c.bf16 %v2450_v57, %v2448_v36  ;;  %2471 = vtanh.f32 %v598_v39  ;;  %v345_v57 = vmul.f32 %v3497_v56, %v2886_v2  ;;  %v344_v27 = vmul.f32 %v3520_v62, %v2886_v2 }
 0x156   :  { %v2454_v7 = vpop.eup %2453  ;;  %1416 = vmatmul.mubr.f32.vlgmr.msra.gmra.mrb[4].mxu0 %v3575_v38  ;;  %2473 = vtanh.f32 %v614_v44  ;;  %v632_v13 = vadd.f32 %v2873_v47, %v296_v37  ;;  %v327_v44 = vmul.f32 %v3487_v40, %v2888_v3  ;;  %v679_v46 = vadd.f32 %v2899_v17, %v343_v20 }
 0x157   :  { %v2456_v51 = vpop.eup %2455  ;;  %1994 = vmatprep.subr.bf16.mxu0 %v1993_v41  ;;  %v2025_v31 = vpack.c.bf16 %v2454_v7, %v2452_v55  ;;  %2475 = vtanh.f32 %v600_v58  ;;  %1557 = vmatprep.mubr.f32.mxu0 %v2633_v33  ;;  %v329_v58 = vmul.f32 %v3497_v56, %v2888_v3  ;;  %v326_v55 = vmul.f32 %v3508_v12, %v2888_v3 }
 0x158   :  { %v2458_v24 = vpop.eup %2457  ;;  %1487 = vmatmul.mubr.f32.vlgmr.msra.gmra.mrb[4].mxu1 %v3575_v38  ;;  %2477 = vtanh.f32 %v616_v1  ;;  %v663_v19 = vadd.f32 %v2901_v18, %v327_v44  ;;  %v358_v44 = vmul.f32 %v3508_v12, %v2920_v53  ;;  %v374_v20 = vmul.f32 %v3508_v12, %v2918_v52 }
 0x159   :  { %v2460_v59 = vpop.eup %2459  ;;  %2026 = vmatprep.subr.bf16.mxu1 %v2025_v31  ;;  %v1995_v30 = vpack.c.bf16 %v2458_v24, %v2456_v51  ;;  %2479 = vtanh.f32 %v631_v0  ;;  %1628 = vmatprep.mubr.f32.mxu1 %v2633_v33  ;;  %v648_v33 = vadd.f32 %v2871_v34, %v312_v28  ;;  %v665_v60 = vadd.f32 %v2901_v18, %v329_v58 }
 0x15a   :  { %v2462_v26 = vpop.eup %2461  ;;  %2481 = vtanh.f32 %v647_v6  ;;  %v681_v0 = vadd.f32 %v2899_v17, %v345_v57  ;;  %v662_v42 = vadd.f32 %v2901_v18, %v326_v55  ;;  %v328_v51 = vmul.f32 %v3520_v62, %v2888_v3 }
 0x15b   :  { %v2464_v39 = vpop.eup %2463  ;;  %1996 = vmatpush1.bf16.msra.mxu0 %v1995_v30  ;;  %v2027_v61 = vpack.c.bf16 %v2462_v26, %v2460_v59  ;;  %2483 = vtanh.f32 %v633_v45  ;;  %v678_v45 = vadd.f32 %v2899_v17, %v342_v16  ;;  %v359_v59 = vmul.f32 %v3487_v40, %v2920_v53 }
 0x15c   :  { %v2466_v25 = vpop.eup %2465  ;;  %2485 = vtanh.f32 %v649_v54  ;;  %v664_v63 = vadd.f32 %v2901_v18, %v328_v51  ;;  %v680_v3 = vadd.f32 %v2899_v17, %v344_v27  ;;  %v360_v58 = vmul.f32 %v3520_v62, %v2920_v53 }
 0x15d   :  { %v2468_v36 = vpop.eup %2467  ;;  %2028 = vmatpush1.bf16.msra.mxu1 %v2027_v61  ;;  %v1997_v29 = vpack.c.bf16 %v2466_v25, %v2464_v39  ;;  %2487 = vtanh.f32 %v630_v43  ;;  %v375_v43 = vmul.f32 %v3487_v40, %v2918_v52  ;;  %v695_v2 = vadd.f32 %v2933_v11, %v359_v59 }
 0x15e   :  { %v2470_v47 = vpop.eup %2469  ;;  %2489 = vtanh.f32 %v646_v5  ;;  %v361_v5 = vmul.f32 %v3497_v56, %v2920_v53  ;;  %v377_v39 = vmul.f32 %v3497_v56, %v2918_v52  ;;  %v376_v57 = vmul.f32 %v3520_v62, %v2918_v52 }
 0x15f   :  { %v2472_v34 = vpop.eup %2471  ;;  %1998 = vmatprep.subr.bf16.mxu0 %v1997_v29  ;;  %v2029_v1 = vpack.c.bf16 %v2470_v47, %v2468_v36  ;;  %2491 = vtanh.f32 %v632_v13  ;;  %v711_v28 = vadd.f32 %v2931_v10, %v375_v43  ;;  %v391_v55 = vmul.f32 %v3487_v40, %v2952_v48 }
 0x160   :  { %v2474_v41 = vpop.eup %2473  ;;  %2493 = vtanh.f32 %v648_v33  ;;  %v697_v13 = vadd.f32 %v2933_v11, %v361_v5  ;;  %v713_v33 = vadd.f32 %v2931_v10, %v377_v39  ;;  %v712_v53 = vadd.f32 %v2931_v10, %v376_v57 }
 0x161   :  { %v2476_v7 = vpop.eup %2475  ;;  %2030 = vmatprep.subr.bf16.mxu1 %v2029_v1  ;;  %v1999_v6 = vpack.c.bf16 %v2474_v41, %v2472_v34  ;;  %2495 = vtanh.f32 %v663_v19  ;;  %v694_v19 = vadd.f32 %v2933_v11, %v358_v44  ;;  %v727_v52 = vadd.f32 %v2966_v9, %v391_v55 }
 0x162   :  { %v2478_v31 = vpop.eup %2477  ;;  %2497 = vtanh.f32 %v679_v46  ;;  %v710_v46 = vadd.f32 %v2931_v10, %v374_v20  ;;  %v409_v51 = vmul.f32 %v3497_v56, %v2950_v32  ;;  %v390_v27 = vmul.f32 %v3508_v12, %v2952_v48 }
 0x163   :  { %v2480_v24 = vpop.eup %2479  ;;  %2000 = vmatpush1.bf16.msra.mxu0 %v1999_v6  ;;  %v2031_v54 = vpack.c.bf16 %v2478_v31, %v2476_v7  ;;  %2499 = vtanh.f32 %v665_v60  ;;  %v696_v60 = vadd.f32 %v2933_v11, %v360_v58  ;;  %v393_v6 = vmul.f32 %v3497_v56, %v2952_v48 }
 0x164   :  { %v2482_v30 = vpop.eup %2481  ;;  %2501 = vtanh.f32 %v681_v0  ;;  %v407_v0 = vmul.f32 %v3487_v40, %v2950_v32  ;;  %v392_v43 = vmul.f32 %v3520_v62, %v2952_v48  ;;  %v423_v39 = vmul.f32 %v3487_v40, %v2985_v50 }
 0x165   :  { %v2484_v37 = vpop.eup %2483  ;;  %2032 = vmatpush1.bf16.msra.mxu1 %v2031_v54  ;;  %v2001_v26 = vpack.c.bf16 %v2482_v30, %v2480_v24  ;;  %2503 = vtanh.f32 %v662_v42  ;;  %v745_v54 = vadd.f32 %v2964_v8, %v409_v51  ;;  %v441_v20 = vmul.f32 %v3497_v56, %v2983_v49 }
 0x166   :  { %v2486_v18 = vpop.eup %2485  ;;  %2505 = vtanh.f32 %v678_v45  ;;  %v743_v42 = vadd.f32 %v2964_v8, %v407_v0  ;;  %v729_v45 = vadd.f32 %v2966_v9, %v393_v6 }
 0x167   :  { %v2488_v17 = vpop.eup %2487  ;;  %2002 = vmatprep.subr.bf16.mxu0 %v2001_v26  ;;  %v2033_v61 = vpack.c.bf16 %v2486_v18, %v2484_v37  ;;  %2507 = vtanh.f32 %v664_v63  ;;  %v406_v63 = vmul.f32 %v3508_v12, %v2950_v32 }
 0x168   :  { %v2490_v25 = vpop.eup %2489  ;;  %2509 = vtanh.f32 %v680_v3  ;;  %v726_v3 = vadd.f32 %v2966_v9, %v390_v27 }
 0x169   :  { %v2492_v36 = vpop.eup %2491  ;;  %2034 = vmatprep.subr.bf16.mxu1 %v2033_v61  ;;  %v2003_v29 = vpack.c.bf16 %v2490_v25, %v2488_v17  ;;  %2511 = vtanh.f32 %v695_v2  ;;  %v742_v26 = vadd.f32 %v2964_v8, %v406_v63  ;;  %v408_v2 = vmul.f32 %v3520_v62, %v2950_v32 }
 0x16a   :  { %v2494_v47 = vpop.eup %2493  ;;  %2513 = vtanh.f32 %v711_v28  ;;  %v728_v28 = vadd.f32 %v2966_v9, %v392_v43  ;;  %v439_v61 = vmul.f32 %v3487_v40, %v2983_v49  ;;  %v759_v32 = vadd.f32 %v3006_v23, %v423_v39 }
 0x16b   :  { %v2496_v34 = vpop.eup %2495  ;;  %2004 = vmatpush1.bf16.msra.mxu0 %v2003_v29  ;;  %v2035_v1 = vpack.c.bf16 %v2494_v47, %v2492_v36  ;;  %2515 = vtanh.f32 %v697_v13  ;;  %v744_v48 = vadd.f32 %v2964_v8, %v408_v2  ;;  %v425_v25 = vmul.f32 %v3497_v56, %v2985_v50 }
 0x16c   :  { %v2498_v41 = vpop.eup %2497  ;;  %2517 = vtanh.f32 %v713_v33  ;;  %v775_v33 = vadd.f32 %v3004_v22, %v439_v61  ;;  %v777_v47 = vadd.f32 %v3004_v22, %v441_v20  ;;  %v456_v43 = vmul.f32 %v3520_v62, %v3025_v4 }
 0x16d   :  { %v2500_v16 = vpop.eup %2499  ;;  %2036 = vmatpush1.bf16.msra.mxu1 %v2035_v1  ;;  %v2005_v7 = vpack.c.bf16 %v2498_v41, %v2496_v34  ;;  %2519 = vtanh.f32 %v694_v19  ;;  %v761_v29 = vadd.f32 %v3006_v23, %v425_v25  ;;  %v422_v19 = vmul.f32 %v3508_v12, %v2985_v50 }
 0x16e   :  { %v2502_v11 = vpop.eup %2501  ;;  %2521 = vtanh.f32 %v710_v46  ;;  %v438_v46 = vmul.f32 %v3508_v12, %v2983_v49  ;;  %v472_v2 = vmul.f32 %v3520_v62, %v3023_v15 }
 0x16f   :  { %v2504_v10 = vpop.eup %2503  ;;  %2006 = vmatprep.subr.bf16.mxu0 %v2005_v7  ;;  %v2037_v31 = vpack.c.bf16 %v2502_v11, %v2500_v16  ;;  %2523 = vtanh.f32 %v696_v60  ;;  %v758_v1 = vadd.f32 %v3006_v23, %v422_v19  ;;  %v424_v60 = vmul.f32 %v3520_v62, %v2985_v50 }
 0x170   :  { %v2506_v24 = vpop.eup %2505  ;;  %2525 = vtanh.f32 %v712_v53  ;;  %v774_v41 = vadd.f32 %v3004_v22, %v438_v46  ;;  %v440_v53 = vmul.f32 %v3520_v62, %v2983_v49  ;;  %v471_v11 = vmul.f32 %v3487_v40, %v3023_v15 }
 0x171   :  { %v2508_v59 = vpop.eup %2507  ;;  %2038 = vmatprep.subr.bf16.mxu1 %v2037_v31  ;;  %v2007_v30 = vpack.c.bf16 %v2506_v24, %v2504_v10  ;;  %2527 = vtanh.f32 %v727_v52  ;;  %v760_v7 = vadd.f32 %v3006_v23, %v424_v60  ;;  %v455_v52 = vmul.f32 %v3487_v40, %v3025_v4 }
 0x172   :  { %v2510_v37 = vpop.eup %2509  ;;  %2529 = vtanh.f32 %v743_v42  ;;  %v776_v50 = vadd.f32 %v3004_v22, %v440_v53  ;;  %v457_v10 = vmul.f32 %v3497_v56, %v3025_v4  ;;  %v807_v31 = vadd.f32 %v3053_v14, %v471_v11 }
 0x173   :  { %v2512_v5 = vpop.eup %2511  ;;  %2008 = vmatpush1.bf16.msra.mxu0 %v2007_v30  ;;  %v2039_v18 = vpack.c.bf16 %v2510_v37, %v2508_v59  ;;  %2531 = vtanh.f32 %v729_v45  ;;  %v791_v49 = vadd.f32 %v3055_v21, %v455_v52  ;;  %v473_v45 = vmul.f32 %v3497_v56, %v3023_v15 }
 0x174   :  { %v2514_v17 = vpop.eup %2513  ;;  %2533 = vtanh.f32 %v745_v54  ;;  %v793_v40 = vadd.f32 %v3055_v21, %v457_v10  ;;  %v454_v24 = vmul.f32 %v3508_v12, %v3025_v4  ;;  %v470_v59 = vmul.f32 %v3508_v12, %v3023_v15 }
 0x175   :  { %v2516_v13 = vpop.eup %2515  ;;  %2040 = vmatpush1.bf16.msra.mxu1 %v2039_v18  ;;  %v2009_v44 = vpack.c.bf16 %v2514_v17, %v2512_v5  ;;  %2535 = vtanh.f32 %v726_v3  ;;  %v809_v63 = vadd.f32 %v3053_v14, %v473_v45  ;;  %v792_v12 = vadd.f32 %v3055_v21, %v456_v43 }
 0x176   :  { %v2518_v9 = vpop.eup %2517  ;;  %2537 = vtanh.f32 %v742_v26  ;;  %v790_v56 = vadd.f32 %v3055_v21, %v454_v24  ;;  %v806_v26 = vadd.f32 %v3053_v14, %v470_v59  ;;  %v808_v39 = vadd.f32 %v3053_v14, %v472_v2 }
 0x177   :  { %v2520_v8 = vpop.eup %2519  ;;  %2010 = vmatprep.subr.bf16.mxu0 %v2009_v44  ;;  %v2041_v36 = vpack.c.bf16 %v2518_v9, %v2516_v13  ;;  %2539 = vtanh.f32 %v728_v28 }
 0x178   :  { %v2522_v58 = vpop.eup %2521  ;;  %2541 = vtanh.f32 %v744_v48 }
 0x179   :  { %v2524_v57 = vpop.eup %2523  ;;  %2042 = vmatprep.subr.bf16.mxu1 %v2041_v36  ;;  %v2011_v34 = vpack.c.bf16 %v2522_v58, %v2520_v8  ;;  %2543 = vtanh.f32 %v759_v32 }
 0x17a   :  { %v2526_v55 = vpop.eup %2525  ;;  %2545 = vtanh.f32 %v775_v33 }
 0x17b   :  { %v2528_v0 = vpop.eup %2527  ;;  %2012 = vmatpush1.bf16.msra.mxu0 %v2011_v34  ;;  %v2043_v16 = vpack.c.bf16 %v2526_v55, %v2524_v57  ;;  %2547 = vtanh.f32 %v761_v29  ;;  %v3723_v55 = vstv %s3758_s4  ;;  %s2635_s4 = smov [#allocation3]  }
 0x17c   :  { %v2530_v6 = vpop.eup %2529  ;;  %2549 = vtanh.f32 %v777_v47  ;;  %s1793_s13 = sshll.u32 %s2635_s4, 4  ;;  %s1794_s13 = int_to_ptr.vmem [resolvable:$true] %s1793_s13 }
 0x17d   :  { %v2532_v42 = vpop.eup %2531  ;;  %2044 = vmatpush1.bf16.msra.mxu1 %v2043_v16  ;;  %v2013_v51 = vpack.c.bf16 %v2530_v6, %v2528_v0  ;;  %2551 = vtanh.f32 %v758_v1  ;;  %s2608_s14 = scalar_lea.vmem %s1794_s13, 256  ;;  %p2613_p1 = scmp.lt.s32.totalorder %s1794_s13, %s1794_s13 }
 0x17e   :  { %v2534_v23 = vpop.eup %2533  ;;  %2553 = vtanh.f32 %v774_v41  ;;  %p2609_p0 = scmp.ne.s32.totalorder %s1794_s13, %s2608_s14  ;;  %p2614_p2 = scmp.lt.s32.totalorder %s2608_s14, %s2608_s14 }
 0x17f   :  { %v2536_v22 = vpop.eup %2535  ;;  %2014 = vmatprep.subr.bf16.mxu0 %v2013_v51  ;;  %v2045_v27 = vpack.c.bf16 %v2534_v23, %v2532_v42  ;;  %2555 = vtanh.f32 %v760_v7 }
 0x180   :  { %v2538_v54 = vpop.eup %2537  ;;  %2557 = vtanh.f32 %v776_v50  ;;  %p2615_p3 = por %p2614_p2, %p2613_p1 }
 0x181   :  { %v2540_v30 = vpop.eup %2539  ;;  %2046 = vmatprep.subr.bf16.mxu1 %v2045_v27  ;;  %v2015_v3 = vpack.c.bf16 %v2538_v54, %v2536_v22  ;;  %2559 = vtanh.f32 %v791_v49  ;;  %v2634_v27 = vmov 1966171168  }
 0x182   :  { %v2542_v37 = vpop.eup %2541  ;;  %2561 = vtanh.f32 %v807_v31  ;;  %p2616_p4 = pnand %p2615_p3, %p2609_p0 }
 0x183   :  { %v2544_v5 = vpop.eup %2543  ;;  %2016 = vmatpush1.bf16.msra.mxu0 %v2015_v3  ;;  %v2047_v18 = vpack.c.bf16 %v2542_v37, %v2540_v30  ;;  %2563 = vtanh.f32 %v793_v40  ;;  %v1690_v40 = vunpack.c.l.s4 %v2634_v27 }
 0x184   :  { %v2546_v28 = vpop.eup %2545  ;;  %2565 = vtanh.f32 %v809_v63 }
 0x185   :  { %v2548_v17 = vpop.eup %2547  ;;  %2048 = vmatpush1.bf16.msra.mxu1 %v2047_v18  ;;  %v2017_v4 = vpack.c.bf16 %v2546_v28, %v2544_v5  ;;  %2567 = vtanh.f32 %v790_v56  ;;  %v1691_v24 = vunpack.c.0.s8 %v1690_v40 }
 0x186   :  { %v2550_v48 = vpop.eup %2549  ;;  %2569 = vtanh.f32 %v806_v26 }
 0x187   :  { %v2552_v61 = vpop.eup %2551  ;;  %2018 = vmatprep.subr.bf16.mxu0 %v2017_v4  ;;  %v2049_v13 = vpack.c.bf16 %v2550_v48, %v2548_v17  ;;  %2571 = vtanh.f32 %v792_v12  ;;  %v1694_v54 = vsub.s32 %v1691_v24, %v2764_v35 }
 0x188   :  { %v2554_v15 = vpop.eup %2553  ;;  %2573 = vtanh.f32 %v808_v39 }
 0x189   :  { %v2556_v62 = vpop.eup %2555  ;;  %2050 = vmatprep.subr.bf16.mxu1 %v2049_v13  ;;  %v2019_v44 = vpack.c.bf16 %v2554_v15, %v2552_v61 }
 0x18a   :  { %v2558_v21 = vpop.eup %2557 }
 0x18b   :  { %v2560_v32 = vpop.eup %2559  ;;  %2020 = vmatpush1.bf16.msra.mxu0 %v2019_v44  ;;  %v2051_v25 = vpack.c.bf16 %v2558_v21, %v2556_v62 }
 0x18c   :  { %v2562_v14 = vpop.eup %2561 }
 0x18d   :  { %v2564_v9 = vpop.eup %2563  ;;  %2052 = vmatpush1.bf16.msra.mxu1 %v2051_v25  ;;  %v2021_v33 = vpack.c.bf16 %v2562_v14, %v2560_v32 }
 0x18e   :  { %v2566_v20 = vpop.eup %2565 }
 0x18f   :  { %v2568_v8 = vpop.eup %2567  ;;  %2022 = vmatprep.subr.bf16.mxu0 %v2021_v33  ;;  %v2053_v36 = vpack.c.bf16 %v2566_v20, %v2564_v9 }
 0x190   :  { %v2570_v29 = vpop.eup %2569 }
 0x191   :  { %v2572_v19 = vpop.eup %2571  ;;  %2054 = vmatprep.subr.bf16.mxu1 %v2053_v36  ;;  %v2023_v58 = vpack.c.bf16 %v2570_v29, %v2568_v8 }
 0x192   :  { %v2574_v47 = vpop.eup %2573 }
 0x193   :  { %2024 = vmatpush1.bf16.msra.mxu0 %v2023_v58  ;;  %v2055_v46 = vpack.c.bf16 %v2574_v47, %v2572_v19 }
 0x195   :  { %2056 = vmatpush1.bf16.msra.mxu1 %v2055_v46 }
 0x196   :  { %1558 = vmatmul.mubr.f32.vlgmr.msra.gmra.mrb[6].mxu0 %v3575_v38 }
 0x198   :  { %1629 = vmatmul.mubr.f32.vlgmr.msra.gmra.mrb[6].mxu1 %v3575_v38 }
 0x1a9   :  { %v1133_v57 = vpop.f32.mrb[0].mxu0 }
 0x1aa   :  { %v1135_v34 = vpop.f32.mrb[1].mxu0  ;;  %v1637_v41 = vadd.f32 %v3723_v55, %v1133_v57 }
 0x1ab   :  { %v1204_v1 = vpop.f32.mrb[0].mxu1  ;;  %v1638_v53 = vadd.f32 %v3723_v55, %v1135_v34 }
 0x1ac   :  { %v1206_v60 = vpop.f32.mrb[1].mxu1  ;;  %v1639_v0 = vadd.f32 %v3723_v55, %v1204_v1  ;;  %2575 = vtanh.f32 %v1637_v41 }
 0x1ad   :  { %v1640_v16 = vadd.f32 %v3723_v55, %v1206_v60  ;;  %2577 = vtanh.f32 %v1638_v53 }
 0x1ae   :  { %2579 = vtanh.f32 %v1639_v0 }
 0x1af   :  { %2581 = vtanh.f32 %v1640_v16 }
 0x1b6   :  { %v2576_v38 = vpop.eup %2575 }
 0x1b7   :  { %v2578_v52 = vpop.eup %2577 }
 0x1b8   :  { %v2580_v11 = vpop.eup %2579  ;;  %v1685_v45 = vcombine.low %v2576_v38, %v2578_v52 }
 0x1b9   :  { %v2582_v49 = vpop.eup %2581 }
 0x1ba   :  { %v1686_v22 = vcombine.low %v2580_v11, %v2582_v49  ;;  %v1695_v59 = vrot.slane %v1685_v45, %v1694_v54 }
 0x1bc   :  { %v1702_v30 = vrot.slane %v1686_v22, %v1694_v54 }
 0x1be   :  { %v1717_v37 = vcombine.low %v1695_v59, %v1702_v30 }
 0x1c0   :  { %v1725_v28 = vrot.slane %v1717_v37, %v1694_v54 }
 0x1e9   :  { %v1275_v7 = vpop.f32.mrb[2].mxu0 }
 0x1ea   :  { %v1641_v6 = vadd.f32 %v3723_v55, %v1275_v7  ;;  %v1277_v50 = vpop.f32.mrb[3].mxu0 }
 0x1eb   :  { %v1346_v42 = vpop.f32.mrb[2].mxu1  ;;  %v1642_v51 = vadd.f32 %v3723_v55, %v1277_v50 }
 0x1ec   :  { %2583 = vtanh.f32 %v1641_v6  ;;  %v1643_v10 = vadd.f32 %v3723_v55, %v1346_v42  ;;  %v1348_v23 = vpop.f32.mrb[3].mxu1 }
 0x1ed   :  { %2585 = vtanh.f32 %v1642_v51  ;;  %v1644_v31 = vadd.f32 %v3723_v55, %v1348_v23 }
 0x1ee   :  { %2587 = vtanh.f32 %v1643_v10 }
 0x1ef   :  { %2589 = vtanh.f32 %v1644_v31 }
 0x1f6   :  { %v2584_v63 = vpop.eup %2583 }
 0x1f7   :  { %v2586_v3 = vpop.eup %2585 }
 0x1f8   :  { %v2588_v56 = vpop.eup %2587  ;;  %v1687_v43 = vcombine.low %v2584_v63, %v2586_v3 }
 0x1f9   :  { %v2590_v26 = vpop.eup %2589 }
 0x1fa   :  { %v1688_v2 = vcombine.low %v2588_v56, %v2590_v26  ;;  %v1709_v5 = vrot.slane %v1687_v43, %v1694_v54 }
 0x1fc   :  { %v1716_v18 = vrot.slane %v1688_v2, %v1694_v54 }
 0x1fe   :  { %v1718_v12 = vcombine.low %v1709_v5, %v1716_v18 }
 0x200   :  { %v1732_v39 = vrot.slane %v1718_v12, %v1694_v54 }
 0x202   :  { %v1733_v17 = vcombine.low %v1725_v28, %v1732_v39 }
 0x204   :  { %1785 = vst [vmem:[#allocation3] sm:$0xff] %v1733_v17 }
 0x229   :  { %v1417_v4 = vpop.f32.mrb[4].mxu0 }
 0x22a   :  { %v1645_v48 = vadd.f32 %v3723_v55, %v1417_v4  ;;  %v1419_v35 = vpop.f32.mrb[5].mxu0 }
 0x22b   :  { %v1488_v61 = vpop.f32.mrb[4].mxu1  ;;  %v1646_v13 = vadd.f32 %v3723_v55, %v1419_v35 }
 0x22c   :  { %2591 = vtanh.f32 %v1645_v48  ;;  %v1647_v15 = vadd.f32 %v3723_v55, %v1488_v61  ;;  %v1490_v62 = vpop.f32.mrb[5].mxu1 }
 0x22d   :  { %2593 = vtanh.f32 %v1646_v13  ;;  %v1648_v44 = vadd.f32 %v3723_v55, %v1490_v62 }
 0x22e   :  { %2595 = vtanh.f32 %v1647_v15 }
 0x22f   :  { %2597 = vtanh.f32 %v1648_v44 }
 0x236   :  { %v2592_v21 = vpop.eup %2591 }
 0x237   :  { %v2594_v32 = vpop.eup %2593 }
 0x238   :  { %v2596_v25 = vpop.eup %2595  ;;  %v1734_v14 = vcombine.low %v2592_v21, %v2594_v32 }
 0x239   :  { %v2598_v9 = vpop.eup %2597 }
 0x23a   :  { %v1735_v33 = vcombine.low %v2596_v25, %v2598_v9  ;;  %v1744_v20 = vrot.slane %v1734_v14, %v1694_v54 }
 0x23c   :  { %v1751_v8 = vrot.slane %v1735_v33, %v1694_v54 }
 0x23e   :  { %v1766_v36 = vcombine.low %v1744_v20, %v1751_v8 }
 0x240   :  { %v1774_v50 = vrot.slane %v1766_v36, %v1694_v54 }
 0x269   :  { %v1559_v29 = vpop.f32.mrb[6].mxu0 }
 0x26a   :  { %v1649_v19 = vadd.f32 %v3723_v55, %v1559_v29  ;;  %v1561_v58 = vpop.f32.mrb[7].mxu0 }
 0x26b   :  { %v1630_v47 = vpop.f32.mrb[6].mxu1  ;;  %v1650_v46 = vadd.f32 %v3723_v55, %v1561_v58 }
 0x26c   :  { %2599 = vtanh.f32 %v1649_v19  ;;  %v1651_v57 = vadd.f32 %v3723_v55, %v1630_v47  ;;  %v1632_v34 = vpop.f32.mrb[7].mxu1 }
 0x26d   :  { %2601 = vtanh.f32 %v1650_v46  ;;  %v1652_v1 = vadd.f32 %v3723_v55, %v1632_v34 }
 0x26e   :  { %2603 = vtanh.f32 %v1651_v57 }
 0x26f   :  { %2605 = vtanh.f32 %v1652_v1 }
 0x276   :  { %v2600_v60 = vpop.eup %2599 }
 0x277   :  { %v2602_v41 = vpop.eup %2601 }
 0x278   :  { %v2604_v53 = vpop.eup %2603  ;;  %v1736_v0 = vcombine.low %v2600_v60, %v2602_v41 }
 0x279   :  { %v2606_v16 = vpop.eup %2605 }
 0x27a   :  { %v1737_v38 = vcombine.low %v2604_v53, %v2606_v16  ;;  %v1758_v7 = vrot.slane %v1736_v0, %v1694_v54 }
 0x27c   :  { %v1765_v52 = vrot.slane %v1737_v38, %v1694_v54 }
 0x27e   :  { %v1767_v6 = vcombine.low %v1758_v7, %v1765_v52 }
 0x280   :  { %v1781_v11 = vrot.slane %v1767_v6, %v1694_v54 }
 0x282   :  { %v1782_v42 = vcombine.low %v1774_v50, %v1781_v11 }
 0x284   :  { %1786 = vst [vmem:[#allocation3 + $0x8] sm:$0xff] %v1782_v42 }
 0x285   :  { %2619 = shalt.err (!%p2616_p4)
}
 0x286   :  { %s2620_s17 = scalar_lea.hbm %s3759_s5, 256 }
 0x287   :  { %p2621_p5 = scmp.ne.s32.totalorder %s3759_s5, %s2620_s17  ;;  %p2624_p6 = scmp.lt.u32.totalorder %s2620_s17, %s3759_s5 }
 0x289   :  { %p2626_p7 = pnand %p2624_p6, %p2621_p5 }
 0x28b   :  { %2629 = shalt.err (!%p2626_p7)
}
 0x28c   :  { %1796 = dma.vmem_to_hbm [thread:$0]  %s1794_s13, 256, %s3759_s5, [#allocation4]  }
 0x28d   :  { %2630 = dma.done.wait [#allocation4], 256  }
 0x28e   :  { %2631 = vsyncadd [#allocation4], 4294967040 }
 0x28f   :  { %1800 = vsyncpa [#allocation4], 1 }

</bundles_post_ra>
